<compile_context>
chip_gen: v7x
topology: tpu7x:2x2x1
jax: 0.10.0
libtpu: 0.0.40
codegen_flags: <defaults>
</compile_context>

<pallas_src>
import math
import functools

import jax
import jax.numpy as jnp
from jax import lax
from jax.experimental import pallas as pl
from jax.experimental.pallas import tpu as pltpu

LN_EPS = 1e-5  # PyTorch nn.LayerNorm default


def _layernorm(v, w, b):
    # One-pass LN: var = E[v^2] - mu^2 (halves the cross-lane reductions).
    mu = jnp.mean(v, axis=-1, keepdims=True)
    ms = jnp.mean(v * v, axis=-1, keepdims=True)
    var = ms - mu * mu
    return (v - mu) * lax.rsqrt(var + LN_EPS) * w + b


def _perceiver_attn_kernel(qlat_ref, lat_ref, x_ref,
                           ln1w_ref, ln1b_ref, ln2w_ref, ln2b_ref,
                           wq_ref, wk_ref, wv_ref, wo_ref,
                           o_ref,
                           q_sc, m_sc, l_sc, acc_sc, oh_sc,
                           *, num_heads, dim_head, compute_dtype,
                           reuse_latents_for_q, exp_in_compute_dtype):
    # qlat_ref: (1, tq, D)   latent-query tile (ignored when reuse_latents_for_q)
    # lat_ref:  (1, n2, D)   full latents (latent part of the KV sequence)
    # x_ref:    (1, tk, D)   image-feature KV tile for this (b, ki)
    # ln*:      (1, D)       LayerNorm affine params (f32)
    # wq/wk:    (D, inner)   projections with dim_head**-0.25 pre-folded (cdt)
    # wv:       (D, inner)   value projection (cdt)
    # wo:       (inner, D)   output projection, unsplit (cdt)
    # o_ref:    (1, tq, D)
    # q_sc:     (H, tq, dh)  cached query heads (cdt)
    # m_sc:     (H, tq, 1)   running row max (f32)
    # l_sc:     (H, tq, 1)   running softmax denominator (f32)
    # acc_sc:   (H, tq, dh)  running weighted-value accumulator (f32)
    # oh_sc:    (tq, inner)  lane-dense staging of normalized heads (cdt)
    cdt = compute_dtype
    # NOTE: program_id / num_programs only at kernel top level (the previous
    # version called program_id inside a pl.when body and failed lowering).
    ki = pl.program_id(2)
    nk = pl.num_programs(2)

    def online_update(k_blk, v_blk):
        # k_blk / v_blk: (L, inner) in compute dtype.  Static per-head lane
        # slices; per-head state goes straight into VMEM scratch.
        for h in range(num_heads):
            sl = slice(h * dim_head, (h + 1) * dim_head)
            kh = k_blk[:, sl]                                    # (L, dh)
            vh = v_blk[:, sl]                                    # (L, dh)
            qh = q_sc[h]                                         # (tq, dh)
            s = lax.dot_general(qh, kh, (((1,), (1,)), ((), ())),
                                preferred_element_type=jnp.float32)  # (tq, L)
            m_prev = m_sc[h]                                     # (tq, 1)
            m_new = jnp.maximum(m_prev, jnp.max(s, axis=-1, keepdims=True))
            alpha = jnp.exp(m_prev - m_new)
            if exp_in_compute_dtype:
                # bf16 exp (v6e/v7x EUP supports bf16; p feeds a bf16 matmul anyway).
                p = jnp.exp((s - m_new).astype(cdt))
            else:
                p = jnp.exp(s - m_new)
            l_sc[h] = alpha * l_sc[h] + jnp.sum(p, axis=-1, keepdims=True,
                                                dtype=jnp.float32)
            acc_sc[h] = alpha * acc_sc[h] + jnp.dot(
                p.astype(cdt), vh, preferred_element_type=jnp.float32)
            m_sc[h] = m_new

    @pl.when(ki == 0)
    def _init():
        m_sc[...] = jnp.full(m_sc.shape, -jnp.inf, dtype=m_sc.dtype)
        l_sc[...] = jnp.zeros(l_sc.shape, dtype=l_sc.dtype)
        acc_sc[...] = jnp.zeros(acc_sc.shape, dtype=acc_sc.dtype)

        ln2w = ln2w_ref[...].astype(jnp.float32)                 # (1, D)
        ln2b = ln2b_ref[...].astype(jnp.float32)

        # LayerNorm(latents): latent part of kv_input = cat([x, latents], -2).
        latn = _layernorm(lat_ref[0].astype(jnp.float32), ln2w, ln2b).astype(cdt)
        if reuse_latents_for_q:
            latn_q = latn                                        # nq == 1: reuse
        else:
            latn_q = _layernorm(qlat_ref[0].astype(jnp.float32),
                                ln2w, ln2b).astype(cdt)          # (tq, D)

        # Query heads (attention scale already folded into Wq).
        q = jnp.dot(latn_q, wq_ref[...], preferred_element_type=jnp.float32)
        for h in range(num_heads):
            q_sc[h] = q[:, h * dim_head:(h + 1) * dim_head].astype(cdt)

        # Latent part of the KV sequence.
        k_lat = jnp.dot(latn, wk_ref[...],
                        preferred_element_type=jnp.float32).astype(cdt)
        v_lat = jnp.dot(latn, wv_ref[...],
                        preferred_element_type=jnp.float32).astype(cdt)
        online_update(k_lat, v_lat)

    # Image-feature KV tile: norm1 + K/V projections + online-softmax update.
    ln1w = ln1w_ref[...].astype(jnp.float32)
    ln1b = ln1b_ref[...].astype(jnp.float32)
    xn = _layernorm(x_ref[0].astype(jnp.float32), ln1w, ln1b).astype(cdt)  # (tk, D)
    k_x = jnp.dot(xn, wk_ref[...], preferred_element_type=jnp.float32).astype(cdt)
    v_x = jnp.dot(xn, wv_ref[...], preferred_element_type=jnp.float32).astype(cdt)
    online_update(k_x, v_x)

    @pl.when(ki == nk - 1)
    def _finalize():
        # Stage normalized per-head outputs into a lane-dense (tq, inner) buffer,
        # then one full-contraction matmul with the unsplit Wout.
        for h in range(num_heads):
            inv_l = 1.0 / l_sc[h]                                # (tq, 1) f32
            oh_sc[:, h * dim_head:(h + 1) * dim_head] = (acc_sc[h] * inv_l).astype(cdt)
        proj = jnp.dot(oh_sc[...], wo_ref[...], preferred_element_type=jnp.float32)
        o_ref[...] = proj[None].astype(o_ref.dtype)


def _pick_tile(n, candidates):
    for c in candidates:
        if c <= n and n % c == 0:
            return c
    return n


def _resident_spec(block_shape, index_map, single_buffer):
    # Constant-index inputs (weights, LN params, full latents) don't need
    # double-buffering: single-buffer them on TPU to halve resident VMEM
    # (decisive on v7x's 64 MiB VMEM).  Fall back if this jax build's
    # BlockSpec doesn't accept pipeline_mode.
    if single_buffer:
        try:
            return pl.BlockSpec(block_shape, index_map,
                                pipeline_mode=pl.Buffered(1))
        except (TypeError, AttributeError):
            pass
    return pl.BlockSpec(block_shape, index_map)


def perceiver_attention(x, latent_queries, params, *, num_heads, dim_head,
                        compute_dtype=None, q_tile=None, kv_tile=None):
    """x: (B, n1, D), latent_queries: (B, n2, D) -> (B, n2, D)."""
    B, n1, D = x.shape
    _, n2, _ = latent_queries.shape
    inner = num_heads * dim_head

    cdt = jnp.dtype(compute_dtype) if compute_dtype is not None else jnp.dtype(x.dtype)
    bf16_compute = cdt == jnp.dtype(jnp.bfloat16)

    ln1_w, ln1_b, ln2_w, ln2_b, wq, wkv, wo = params
    # LN params as (1, D) f32 refs (LN math stays f32 on every chip generation).
    ln1_w = ln1_w.reshape(1, D).astype(jnp.float32)
    ln1_b = ln1_b.reshape(1, D).astype(jnp.float32)
    ln2_w = ln2_w.reshape(1, D).astype(jnp.float32)
    ln2_b = ln2_b.reshape(1, D).astype(jnp.float32)

    # One-time parameter prep (done once offline in deployment):
    #  * fold the 1/sqrt(sqrt(dim_head)) scale into Wq and Wk,
    #  * split Wkv -> Wk, Wv (no in-kernel concat / lane split of kv),
    #  * cast MXU-facing weights to the compute dtype (bf16 halves weight
    #    VMEM/DMA and doubles MXU throughput; accumulation stays f32).
    scale = dim_head ** -0.25
    wq_s = (wq * scale).astype(cdt)
    wk_s = (wkv[:, :inner] * scale).astype(cdt)
    wv_c = wkv[:, inner:].astype(cdt)
    wo_c = wo.astype(cdt)                                   # (inner, D), unsplit

    # Tile selection: keep the whole latent sequence in one q tile whenever it
    # fits (nq == 1 -> no re-streaming / re-projecting of KV tiles per q tile);
    # large KV tiles amortize the ~0.35us per-grid-step overhead.
    if q_tile is not None:
        tq = q_tile
    elif n2 <= 512:
        tq = n2
    else:
        tq = _pick_tile(n2, (256, 128))
    tk = kv_tile or _pick_tile(n1, (1024, 512, 256, 128))
    assert n2 % tq == 0 and n1 % tk == 0, "tiles must divide sequence lengths"
    # TODO(synk): add in-kernel masking for ragged n1/n2 tails instead of
    # requiring divisibility.
    nq = n2 // tq
    nk = n1 // tk
    reuse_latents_for_q = (nq == 1)

    kernel = functools.partial(_perceiver_attn_kernel,
                               num_heads=num_heads, dim_head=dim_head,
                               compute_dtype=cdt,
                               reuse_latents_for_q=reuse_latents_for_q,
                               exp_in_compute_dtype=bf16_compute)

    on_tpu = jax.default_backend() == "tpu"
    rspec = lambda shape, imap: _resident_spec(shape, imap, on_tpu)

    in_specs = [
        pl.BlockSpec((1, tq, D), lambda b, qi, ki: (b, qi, 0)),   # latent q tile
        rspec((1, n2, D), lambda b, qi, ki: (b, 0, 0)),           # full latents (KV)
        pl.BlockSpec((1, tk, D), lambda b, qi, ki: (b, ki, 0)),   # x (KV tiles)
        rspec((1, D), lambda b, qi, ki: (0, 0)),                  # ln1 weight
        rspec((1, D), lambda b, qi, ki: (0, 0)),                  # ln1 bias
        rspec((1, D), lambda b, qi, ki: (0, 0)),                  # ln2 weight
        rspec((1, D), lambda b, qi, ki: (0, 0)),                  # ln2 bias
        rspec((D, inner), lambda b, qi, ki: (0, 0)),              # Wq (scaled)
        rspec((D, inner), lambda b, qi, ki: (0, 0)),              # Wk (scaled)
        rspec((D, inner), lambda b, qi, ki: (0, 0)),              # Wv
        rspec((inner, D), lambda b, qi, ki: (0, 0)),              # Wout (unsplit)
    ]

    # TODO(synk): v7x-only — split heads (or the nk reduction) across the two
    # TensorCores via core_map/CMEM to keep both cores busy at B=1, nq=1.
    return pl.pallas_call(
        kernel,
        out_shape=jax.ShapeDtypeStruct((B, n2, D), latent_queries.dtype),
        grid_spec=pltpu.PrefetchScalarGridSpec(
            num_scalar_prefetch=0,
            grid=(B, nq, nk),
            in_specs=in_specs,
            out_specs=pl.BlockSpec((1, tq, D), lambda b, qi, ki: (b, qi, 0)),
            scratch_shapes=[
                pltpu.VMEM((num_heads, tq, dim_head), cdt),           # q heads
                pltpu.VMEM((num_heads, tq, 1), jnp.float32),          # running max
                pltpu.VMEM((num_heads, tq, 1), jnp.float32),          # running denom
                pltpu.VMEM((num_heads, tq, dim_head), jnp.float32),   # out accumulator
                pltpu.VMEM((tq, inner), cdt),                         # staged heads
            ],
        ),
        compiler_params=pltpu.CompilerParams(
            dimension_semantics=("parallel", "parallel", "arbitrary"),
            vmem_limit_bytes=40 * 1024 * 1024,   # fits v7x's 64 MiB with headroom
        ),
    )(latent_queries, latent_queries, x,
      ln1_w, ln1_b, ln2_w, ln2_b, wq_s, wk_s, wv_c, wo_c)


def perceiver_attention_ref(x, latent_queries, params, *, num_heads, dim_head):
    """Pure-JAX reference mirroring the PyTorch forward."""
    ln1_w, ln1_b, ln2_w, ln2_b, wq, wkv, wo = params
    inner = num_heads * dim_head

    def ln(v, w, b):
        mu = jnp.mean(v, axis=-1, keepdims=True)
        var = jnp.mean((v - mu) ** 2, axis=-1, keepdims=True)
        return (v - mu) * jax.lax.rsqrt(var + LN_EPS) * w + b

    xn = ln(x, ln1_w, ln1_b)
    lat = ln(latent_queries, ln2_w, ln2_b)
    b, l, _ = lat.shape
    q = lat @ wq
    kv_in = jnp.concatenate([xn, lat], axis=-2)
    kv = kv_in @ wkv
    k, v = kv[..., :inner], kv[..., inner:]

    def to_heads(t):
        bs, length, _ = t.shape
        return t.reshape(bs, length, num_heads, -1).transpose(0, 2, 1, 3)

    q, k, v = to_heads(q), to_heads(k), to_heads(v)
    s = 1.0 / math.sqrt(math.sqrt(dim_head))
    weight = jnp.einsum("bhqd,bhkd->bhqk", q * s, k * s)
    attn = jax.nn.softmax(weight.astype(jnp.float32), axis=-1).astype(weight.dtype)
    out = jnp.einsum("bhqk,bhkd->bhqd", attn, v)
    out = out.transpose(0, 2, 1, 3).reshape(b, l, -1)
    return out @ wo


if __name__ == "__main__":
    B, n1, n2 = 2, 16, 8
    dim = 32
    dim_head = 8
    num_heads = 4
    inner = dim_head * num_heads

    key = jax.random.PRNGKey(0)
    k_x, k_lat, k_q, k_kv, k_o, k_l1w, k_l1b, k_l2w, k_l2b = jax.random.split(key, 9)

    x = jax.random.normal(k_x, (B, n1, dim), dtype=jnp.float32)
    latent_queries = jax.random.normal(k_lat, (B, n2, dim), dtype=jnp.float32)

    ln1_w = 1.0 + 0.1 * jax.random.normal(k_l1w, (dim,), dtype=jnp.float32)
    ln1_b = 0.05 * jax.random.normal(k_l1b, (dim,), dtype=jnp.float32)
    ln2_w = 1.0 + 0.1 * jax.random.normal(k_l2w, (dim,), dtype=jnp.float32)
    ln2_b = 0.05 * jax.random.normal(k_l2b, (dim,), dtype=jnp.float32)
    wq = jax.random.normal(k_q, (dim, inner), dtype=jnp.float32) * 0.05
    wkv = jax.random.normal(k_kv, (dim, 2 * inner), dtype=jnp.float32) * 0.05
    wo = jax.random.normal(k_o, (inner, dim), dtype=jnp.float32) * 0.05
    params = (ln1_w, ln1_b, ln2_w, ln2_b, wq, wkv, wo)

    ref = perceiver_attention_ref(x, latent_queries, params,
                                  num_heads=num_heads, dim_head=dim_head)

    # f32 compute path (v5e-friendly): tight check against the reference.
    out_f32 = jax.block_until_ready(
        perceiver_attention(x, latent_queries, params,
                            num_heads=num_heads, dim_head=dim_head,
                            compute_dtype=jnp.float32))
    assert out_f32.shape == (B, n2, dim)
    assert jnp.allclose(out_f32, ref, atol=1e-4, rtol=1e-4), "f32 mismatch vs reference"

    # bf16 MXU path (production configuration on v6e/v7x): looser tolerance.
    out_bf16 = jax.block_until_ready(
        perceiver_attention(x, latent_queries, params,
                            num_heads=num_heads, dim_head=dim_head,
                            compute_dtype=jnp.bfloat16))
    assert out_bf16.shape == (B, n2, dim)
    assert jnp.allclose(out_bf16, ref, atol=5e-2, rtol=5e-2), "bf16 mismatch vs reference"

    print("KERNEL_OK")
</pallas_src>

<mosaic_0001>
module attributes {stable_mosaic.version = 11 : i64} {
  func.func @_perceiver_attn_kernel(%arg0: i32, %arg1: i32, %arg2: i32, %arg3: memref<1x8x32xf32, #tpu.memory_space<vmem>>, %arg4: memref<1x8x32xf32, #tpu.memory_space<vmem>>, %arg5: memref<1x16x32xf32, #tpu.memory_space<vmem>>, %arg6: memref<1x32xf32, #tpu.memory_space<vmem>>, %arg7: memref<1x32xf32, #tpu.memory_space<vmem>>, %arg8: memref<1x32xf32, #tpu.memory_space<vmem>>, %arg9: memref<1x32xf32, #tpu.memory_space<vmem>>, %arg10: memref<32x32xf32, #tpu.memory_space<vmem>>, %arg11: memref<32x32xf32, #tpu.memory_space<vmem>>, %arg12: memref<32x32xf32, #tpu.memory_space<vmem>>, %arg13: memref<32x32xf32, #tpu.memory_space<vmem>>, %arg14: memref<1x8x32xf32, #tpu.memory_space<vmem>>, %arg15: memref<4x8x8xf32, #tpu.memory_space<vmem>>, %arg16: memref<4x8x1xf32, #tpu.memory_space<vmem>>, %arg17: memref<4x8x1xf32, #tpu.memory_space<vmem>>, %arg18: memref<4x8x8xf32, #tpu.memory_space<vmem>>, %arg19: memref<8x32xf32, #tpu.memory_space<vmem>>) attributes {dimension_semantics = [#tpu.dimension_semantics<parallel>, #tpu.dimension_semantics<parallel>, #tpu.dimension_semantics<arbitrary>], iteration_bounds = array<i64: 2, 1, 1>, scalar_prefetch = 0 : i64, scratch_operands = 5 : i64, tpu.core_type = #tpu.core_type<tc>, window_params = [{transform_indices = @transform_0, window_bounds = array<i64: 1, 8, 32>}, {transform_indices = @transform_1, window_bounds = array<i64: 1, 8, 32>}, {transform_indices = @transform_2, window_bounds = array<i64: 1, 16, 32>}, {pipeline_mode = #tpu.pipeline_mode<synchronous>, transform_indices = @transform_3, window_bounds = array<i64: 1, 32>}, {pipeline_mode = #tpu.pipeline_mode<synchronous>, transform_indices = @transform_4, window_bounds = array<i64: 1, 32>}, {pipeline_mode = #tpu.pipeline_mode<synchronous>, transform_indices = @transform_5, window_bounds = array<i64: 1, 32>}, {pipeline_mode = #tpu.pipeline_mode<synchronous>, transform_indices = @transform_6, window_bounds = array<i64: 1, 32>}, {pipeline_mode = #tpu.pipeline_mode<synchronous>, transform_indices = @transform_7, window_bounds = array<i64: 32, 32>}, {pipeline_mode = #tpu.pipeline_mode<synchronous>, transform_indices = @transform_8, window_bounds = array<i64: 32, 32>}, {pipeline_mode = #tpu.pipeline_mode<synchronous>, transform_indices = @transform_9, window_bounds = array<i64: 32, 32>}, {pipeline_mode = #tpu.pipeline_mode<synchronous>, transform_indices = @transform_10, window_bounds = array<i64: 32, 32>}, {transform_indices = @transform_11, window_bounds = array<i64: 1, 8, 32>}]} {
    %c0_i32 = arith.constant 0 : i32
    %0 = arith.cmpi eq, %arg2, %c0_i32 : i32
    %1 = arith.extui %0 : i1 to i32
    %c0_i32_0 = arith.constant 0 : i32
    %2 = arith.cmpi ne, %1, %c0_i32_0 : i32
    scf.if %2 {
      %cst_116 = arith.constant 0xFF800000 : f32
      %180 = vector.broadcast %cst_116 : f32 to vector<4x8x1xf32>
      %c0_117 = arith.constant 0 : index
      %c0_118 = arith.constant 0 : index
      %c0_119 = arith.constant 0 : index
      %181 = vector.load %arg16[%c0_117, %c0_118, %c0_119] : memref<4x8x1xf32, #tpu.memory_space<vmem>>, vector<4x8x1xf32>
      tpu.vector_store %arg16[%c0_117, %c0_118, %c0_119], %180 {strides = array<i32>} : memref<4x8x1xf32, #tpu.memory_space<vmem>>, vector<4x8x1xf32>,
      %cst_120 = arith.constant 0.000000e+00 : f32
      %182 = vector.broadcast %cst_120 : f32 to vector<4x8x1xf32>
      %c0_121 = arith.constant 0 : index
      %c0_122 = arith.constant 0 : index
      %c0_123 = arith.constant 0 : index
      %183 = vector.load %arg17[%c0_121, %c0_122, %c0_123] : memref<4x8x1xf32, #tpu.memory_space<vmem>>, vector<4x8x1xf32>
      tpu.vector_store %arg17[%c0_121, %c0_122, %c0_123], %182 {strides = array<i32>} : memref<4x8x1xf32, #tpu.memory_space<vmem>>, vector<4x8x1xf32>,
      %cst_124 = arith.constant 0.000000e+00 : f32
      %184 = vector.broadcast %cst_124 : f32 to vector<4x8x8xf32>
      %c0_125 = arith.constant 0 : index
      %c0_126 = arith.constant 0 : index
      %c0_127 = arith.constant 0 : index
      %185 = vector.load %arg18[%c0_125, %c0_126, %c0_127] : memref<4x8x8xf32, #tpu.memory_space<vmem>>, vector<4x8x8xf32>
      tpu.vector_store %arg18[%c0_125, %c0_126, %c0_127], %184 {strides = array<i32>} : memref<4x8x8xf32, #tpu.memory_space<vmem>>, vector<4x8x8xf32>,
      %c0_128 = arith.constant 0 : index
      %c0_129 = arith.constant 0 : index
      %186 = vector.load %arg8[%c0_128, %c0_129] : memref<1x32xf32, #tpu.memory_space<vmem>>, vector<1x32xf32>
      %c0_130 = arith.constant 0 : index
      %c0_131 = arith.constant 0 : index
      %187 = vector.load %arg9[%c0_130, %c0_131] : memref<1x32xf32, #tpu.memory_space<vmem>>, vector<1x32xf32>
      %c0_132 = arith.constant 0 : index
      %c0_133 = arith.constant 0 : index
      %c0_134 = arith.constant 0 : index
      %188 = vector.load %arg4[%c0_132, %c0_133, %c0_134] : memref<1x8x32xf32, #tpu.memory_space<vmem>>, vector<1x8x32xf32>
      %189 = vector.shape_cast %188 : vector<1x8x32xf32> to vector<8x32xf32>
      %cst_135 = arith.constant dense<0.000000e+00> : vector<8xf32>
      %190 = vector.multi_reduction <add>, %189, %cst_135 [1] : vector<8x32xf32> to vector<8xf32>
      %191 = vector.shape_cast %190 : vector<8xf32> to vector<8x1xf32>
      %cst_136 = arith.constant 3.200000e+01 : f32
      %192 = vector.broadcast %cst_136 : f32 to vector<8x1xf32>
      %193 = arith.divf %191, %192 : vector<8x1xf32>
      %194 = arith.mulf %189, %189 : vector<8x32xf32>
      %cst_137 = arith.constant dense<0.000000e+00> : vector<8xf32>
      %195 = vector.multi_reduction <add>, %194, %cst_137 [1] : vector<8x32xf32> to vector<8xf32>
      %196 = vector.shape_cast %195 : vector<8xf32> to vector<8x1xf32>
      %cst_138 = arith.constant 3.200000e+01 : f32
      %197 = vector.broadcast %cst_138 : f32 to vector<8x1xf32>
      %198 = arith.divf %196, %197 : vector<8x1xf32>
      %199 = arith.mulf %193, %193 : vector<8x1xf32>
      %200 = arith.subf %198, %199 : vector<8x1xf32>
      %201 = vector.broadcast %193 : vector<8x1xf32> to vector<8x32xf32>
      %202 = arith.subf %189, %201 : vector<8x32xf32>
      %cst_139 = arith.constant 9.99999974E-6 : f32
      %203 = vector.broadcast %cst_139 : f32 to vector<8x1xf32>
      %204 = arith.addf %200, %203 : vector<8x1xf32>
      %205 = math.rsqrt %204 : vector<8x1xf32>
      %206 = vector.broadcast %205 : vector<8x1xf32> to vector<8x32xf32>
      %207 = arith.mulf %202, %206 : vector<8x32xf32>
      %208 = vector.broadcast %186 : vector<1x32xf32> to vector<8x32xf32>
      %209 = arith.mulf %207, %208 : vector<8x32xf32>
      %210 = vector.broadcast %187 : vector<1x32xf32> to vector<8x32xf32>
      %211 = arith.addf %209, %210 : vector<8x32xf32>
      %c0_140 = arith.constant 0 : index
      %c0_141 = arith.constant 0 : index
      %212 = vector.load %arg10[%c0_140, %c0_141] : memref<32x32xf32, #tpu.memory_space<vmem>>, vector<32x32xf32>
      %cst_142 = arith.constant dense<0.000000e+00> : vector<8x32xf32>
      %213 = tpu.matmul %211, %212, %cst_142 {dimension_numbers = #tpu.dot_dimension_numbers<[1], [0], [0], [1], [0, 0, 1, 1], [], []>} : vector<8x32xf32>, vector<32x32xf32>, vector<8x32xf32> -> vector<8x32xf32>
      %214 = vector.extract_strided_slice %213 {offsets = [0, 0], sizes = [8, 8], strides = [1, 1]} : vector<8x32xf32> to vector<8x8xf32>
      %c0_143 = arith.constant 0 : index
      %c0_144 = arith.constant 0 : index
      %c0_145 = arith.constant 0 : index
      %215 = vector.load %arg15[%c0_143, %c0_144, %c0_145] : memref<4x8x8xf32, #tpu.memory_space<vmem>>, vector<1x8x8xf32>
      %216 = vector.shape_cast %215 : vector<1x8x8xf32> to vector<8x8xf32>
      %217 = vector.shape_cast %214 : vector<8x8xf32> to vector<1x8x8xf32>
      tpu.vector_store %arg15[%c0_143, %c0_144, %c0_145], %217 {strides = array<i32>} : memref<4x8x8xf32, #tpu.memory_space<vmem>>, vector<1x8x8xf32>,
      %218 = vector.extract_strided_slice %213 {offsets = [0, 8], sizes = [8, 8], strides = [1, 1]} : vector<8x32xf32> to vector<8x8xf32>
      %c1_146 = arith.constant 1 : index
      %c0_147 = arith.constant 0 : index
      %c0_148 = arith.constant 0 : index
      %219 = vector.load %arg15[%c1_146, %c0_147, %c0_148] : memref<4x8x8xf32, #tpu.memory_space<vmem>>, vector<1x8x8xf32>
      %220 = vector.shape_cast %219 : vector<1x8x8xf32> to vector<8x8xf32>
      %221 = vector.shape_cast %218 : vector<8x8xf32> to vector<1x8x8xf32>
      tpu.vector_store %arg15[%c1_146, %c0_147, %c0_148], %221 {strides = array<i32>} : memref<4x8x8xf32, #tpu.memory_space<vmem>>, vector<1x8x8xf32>,
      %222 = vector.extract_strided_slice %213 {offsets = [0, 16], sizes = [8, 8], strides = [1, 1]} : vector<8x32xf32> to vector<8x8xf32>
      %c2_149 = arith.constant 2 : index
      %c0_150 = arith.constant 0 : index
      %c0_151 = arith.constant 0 : index
      %223 = vector.load %arg15[%c2_149, %c0_150, %c0_151] : memref<4x8x8xf32, #tpu.memory_space<vmem>>, vector<1x8x8xf32>
      %224 = vector.shape_cast %223 : vector<1x8x8xf32> to vector<8x8xf32>
      %225 = vector.shape_cast %222 : vector<8x8xf32> to vector<1x8x8xf32>
      tpu.vector_store %arg15[%c2_149, %c0_150, %c0_151], %225 {strides = array<i32>} : memref<4x8x8xf32, #tpu.memory_space<vmem>>, vector<1x8x8xf32>,
      %226 = vector.extract_strided_slice %213 {offsets = [0, 24], sizes = [8, 8], strides = [1, 1]} : vector<8x32xf32> to vector<8x8xf32>
      %c3_152 = arith.constant 3 : index
      %c0_153 = arith.constant 0 : index
      %c0_154 = arith.constant 0 : index
      %227 = vector.load %arg15[%c3_152, %c0_153, %c0_154] : memref<4x8x8xf32, #tpu.memory_space<vmem>>, vector<1x8x8xf32>
      %228 = vector.shape_cast %227 : vector<1x8x8xf32> to vector<8x8xf32>
      %229 = vector.shape_cast %226 : vector<8x8xf32> to vector<1x8x8xf32>
      tpu.vector_store %arg15[%c3_152, %c0_153, %c0_154], %229 {strides = array<i32>} : memref<4x8x8xf32, #tpu.memory_space<vmem>>, vector<1x8x8xf32>,
      %c0_155 = arith.constant 0 : index
      %c0_156 = arith.constant 0 : index
      %230 = vector.load %arg11[%c0_155, %c0_156] : memref<32x32xf32, #tpu.memory_space<vmem>>, vector<32x32xf32>
      %cst_157 = arith.constant dense<0.000000e+00> : vector<8x32xf32>
      %231 = tpu.matmul %211, %230, %cst_157 {dimension_numbers = #tpu.dot_dimension_numbers<[1], [0], [0], [1], [0, 0, 1, 1], [], []>} : vector<8x32xf32>, vector<32x32xf32>, vector<8x32xf32> -> vector<8x32xf32>
      %c0_158 = arith.constant 0 : index
      %c0_159 = arith.constant 0 : index
      %232 = vector.load %arg12[%c0_158, %c0_159] : memref<32x32xf32, #tpu.memory_space<vmem>>, vector<32x32xf32>
      %cst_160 = arith.constant dense<0.000000e+00> : vector<8x32xf32>
      %233 = tpu.matmul %211, %232, %cst_160 {dimension_numbers = #tpu.dot_dimension_numbers<[1], [0], [0], [1], [0, 0, 1, 1], [], []>} : vector<8x32xf32>, vector<32x32xf32>, vector<8x32xf32> -> vector<8x32xf32>
      %234 = vector.extract_strided_slice %231 {offsets = [0, 0], sizes = [8, 8], strides = [1, 1]} : vector<8x32xf32> to vector<8x8xf32>
      %235 = vector.extract_strided_slice %233 {offsets = [0, 0], sizes = [8, 8], strides = [1, 1]} : vector<8x32xf32> to vector<8x8xf32>
      %c0_161 = arith.constant 0 : index
      %c0_162 = arith.constant 0 : index
      %c0_163 = arith.constant 0 : index
      %236 = vector.load %arg15[%c0_161, %c0_162, %c0_163] : memref<4x8x8xf32, #tpu.memory_space<vmem>>, vector<1x8x8xf32>
      %237 = vector.shape_cast %236 : vector<1x8x8xf32> to vector<8x8xf32>
      %cst_164 = arith.constant dense<0.000000e+00> : vector<8x8xf32>
      %238 = tpu.matmul %237, %234, %cst_164 {dimension_numbers = #tpu.dot_dimension_numbers<[1], [1], [0], [0], [0, 0, 1, 0], [], []>} : vector<8x8xf32>, vector<8x8xf32>, vector<8x8xf32> -> vector<8x8xf32>
      %c0_165 = arith.constant 0 : index
      %c0_166 = arith.constant 0 : index
      %c0_167 = arith.constant 0 : index
      %239 = vector.load %arg16[%c0_165, %c0_166, %c0_167] : memref<4x8x1xf32, #tpu.memory_space<vmem>>, vector<1x8x1xf32>
      %240 = vector.shape_cast %239 : vector<1x8x1xf32> to vector<8x1xf32>
      %cst_168 = arith.constant dense<0xFF800000> : vector<8xf32>
      %241 = vector.multi_reduction <maximumf>, %238, %cst_168 [1] : vector<8x8xf32> to vector<8xf32>
      %242 = vector.shape_cast %241 : vector<8xf32> to vector<8x1xf32>
      %243 = arith.maximumf %240, %242 : vector<8x1xf32>
      %244 = arith.subf %240, %243 : vector<8x1xf32>
      %245 = math.exp %244 : vector<8x1xf32>
      %246 = vector.broadcast %243 : vector<8x1xf32> to vector<8x8xf32>
      %247 = arith.subf %238, %246 : vector<8x8xf32>
      %248 = math.exp %247 : vector<8x8xf32>
      %c0_169 = arith.constant 0 : index
      %c0_170 = arith.constant 0 : index
      %c0_171 = arith.constant 0 : index
      %249 = vector.load %arg17[%c0_169, %c0_170, %c0_171] : memref<4x8x1xf32, #tpu.memory_space<vmem>>, vector<1x8x1xf32>
      %250 = vector.shape_cast %249 : vector<1x8x1xf32> to vector<8x1xf32>
      %251 = arith.mulf %245, %250 : vector<8x1xf32>
      %cst_172 = arith.constant dense<0.000000e+00> : vector<8xf32>
      %252 = vector.multi_reduction <add>, %248, %cst_172 [1] : vector<8x8xf32> to vector<8xf32>
      %253 = vector.shape_cast %252 : vector<8xf32> to vector<8x1xf32>
      %254 = arith.addf %251, %253 : vector<8x1xf32>
      %c0_173 = arith.constant 0 : index
      %c0_174 = arith.constant 0 : index
      %c0_175 = arith.constant 0 : index
      %255 = vector.load %arg17[%c0_173, %c0_174, %c0_175] : memref<4x8x1xf32, #tpu.memory_space<vmem>>, vector<1x8x1xf32>
      %256 = vector.shape_cast %255 : vector<1x8x1xf32> to vector<8x1xf32>
      %257 = vector.shape_cast %254 : vector<8x1xf32> to vector<1x8x1xf32>
      tpu.vector_store %arg17[%c0_173, %c0_174, %c0_175], %257 {strides = array<i32>} : memref<4x8x1xf32, #tpu.memory_space<vmem>>, vector<1x8x1xf32>,
      %c0_176 = arith.constant 0 : index
      %c0_177 = arith.constant 0 : index
      %c0_178 = arith.constant 0 : index
      %258 = vector.load %arg18[%c0_176, %c0_177, %c0_178] : memref<4x8x8xf32, #tpu.memory_space<vmem>>, vector<1x8x8xf32>
      %259 = vector.shape_cast %258 : vector<1x8x8xf32> to vector<8x8xf32>
      %260 = vector.broadcast %245 : vector<8x1xf32> to vector<8x8xf32>
      %261 = arith.mulf %260, %259 : vector<8x8xf32>
      %cst_179 = arith.constant dense<0.000000e+00> : vector<8x8xf32>
      %262 = tpu.matmul %248, %235, %cst_179 {dimension_numbers = #tpu.dot_dimension_numbers<[1], [0], [0], [1], [0, 0, 1, 1], [], []>} : vector<8x8xf32>, vector<8x8xf32>, vector<8x8xf32> -> vector<8x8xf32>
      %263 = arith.addf %261, %262 : vector<8x8xf32>
      %c0_180 = arith.constant 0 : index
      %c0_181 = arith.constant 0 : index
      %c0_182 = arith.constant 0 : index
      %264 = vector.load %arg18[%c0_180, %c0_181, %c0_182] : memref<4x8x8xf32, #tpu.memory_space<vmem>>, vector<1x8x8xf32>
      %265 = vector.shape_cast %264 : vector<1x8x8xf32> to vector<8x8xf32>
      %266 = vector.shape_cast %263 : vector<8x8xf32> to vector<1x8x8xf32>
      tpu.vector_store %arg18[%c0_180, %c0_181, %c0_182], %266 {strides = array<i32>} : memref<4x8x8xf32, #tpu.memory_space<vmem>>, vector<1x8x8xf32>,
      %c0_183 = arith.constant 0 : index
      %c0_184 = arith.constant 0 : index
      %c0_185 = arith.constant 0 : index
      %267 = vector.load %arg16[%c0_183, %c0_184, %c0_185] : memref<4x8x1xf32, #tpu.memory_space<vmem>>, vector<1x8x1xf32>
      %268 = vector.shape_cast %267 : vector<1x8x1xf32> to vector<8x1xf32>
      %269 = vector.shape_cast %243 : vector<8x1xf32> to vector<1x8x1xf32>
      tpu.vector_store %arg16[%c0_183, %c0_184, %c0_185], %269 {strides = array<i32>} : memref<4x8x1xf32, #tpu.memory_space<vmem>>, vector<1x8x1xf32>,
      %270 = vector.extract_strided_slice %231 {offsets = [0, 8], sizes = [8, 8], strides = [1, 1]} : vector<8x32xf32> to vector<8x8xf32>
      %271 = vector.extract_strided_slice %233 {offsets = [0, 8], sizes = [8, 8], strides = [1, 1]} : vector<8x32xf32> to vector<8x8xf32>
      %c1_186 = arith.constant 1 : index
      %c0_187 = arith.constant 0 : index
      %c0_188 = arith.constant 0 : index
      %272 = vector.load %arg15[%c1_186, %c0_187, %c0_188] : memref<4x8x8xf32, #tpu.memory_space<vmem>>, vector<1x8x8xf32>
      %273 = vector.shape_cast %272 : vector<1x8x8xf32> to vector<8x8xf32>
      %cst_189 = arith.constant dense<0.000000e+00> : vector<8x8xf32>
      %274 = tpu.matmul %273, %270, %cst_189 {dimension_numbers = #tpu.dot_dimension_numbers<[1], [1], [0], [0], [0, 0, 1, 0], [], []>} : vector<8x8xf32>, vector<8x8xf32>, vector<8x8xf32> -> vector<8x8xf32>
      %c1_190 = arith.constant 1 : index
      %c0_191 = arith.constant 0 : index
      %c0_192 = arith.constant 0 : index
      %275 = vector.load %arg16[%c1_190, %c0_191, %c0_192] : memref<4x8x1xf32, #tpu.memory_space<vmem>>, vector<1x8x1xf32>
      %276 = vector.shape_cast %275 : vector<1x8x1xf32> to vector<8x1xf32>
      %cst_193 = arith.constant dense<0xFF800000> : vector<8xf32>
      %277 = vector.multi_reduction <maximumf>, %274, %cst_193 [1] : vector<8x8xf32> to vector<8xf32>
      %278 = vector.shape_cast %277 : vector<8xf32> to vector<8x1xf32>
      %279 = arith.maximumf %276, %278 : vector<8x1xf32>
      %280 = arith.subf %276, %279 : vector<8x1xf32>
      %281 = math.exp %280 : vector<8x1xf32>
      %282 = vector.broadcast %279 : vector<8x1xf32> to vector<8x8xf32>
      %283 = arith.subf %274, %282 : vector<8x8xf32>
      %284 = math.exp %283 : vector<8x8xf32>
      %c1_194 = arith.constant 1 : index
      %c0_195 = arith.constant 0 : index
      %c0_196 = arith.constant 0 : index
      %285 = vector.load %arg17[%c1_194, %c0_195, %c0_196] : memref<4x8x1xf32, #tpu.memory_space<vmem>>, vector<1x8x1xf32>
      %286 = vector.shape_cast %285 : vector<1x8x1xf32> to vector<8x1xf32>
      %287 = arith.mulf %281, %286 : vector<8x1xf32>
      %cst_197 = arith.constant dense<0.000000e+00> : vector<8xf32>
      %288 = vector.multi_reduction <add>, %284, %cst_197 [1] : vector<8x8xf32> to vector<8xf32>
      %289 = vector.shape_cast %288 : vector<8xf32> to vector<8x1xf32>
      %290 = arith.addf %287, %289 : vector<8x1xf32>
      %c1_198 = arith.constant 1 : index
      %c0_199 = arith.constant 0 : index
      %c0_200 = arith.constant 0 : index
      %291 = vector.load %arg17[%c1_198, %c0_199, %c0_200] : memref<4x8x1xf32, #tpu.memory_space<vmem>>, vector<1x8x1xf32>
      %292 = vector.shape_cast %291 : vector<1x8x1xf32> to vector<8x1xf32>
      %293 = vector.shape_cast %290 : vector<8x1xf32> to vector<1x8x1xf32>
      tpu.vector_store %arg17[%c1_198, %c0_199, %c0_200], %293 {strides = array<i32>} : memref<4x8x1xf32, #tpu.memory_space<vmem>>, vector<1x8x1xf32>,
      %c1_201 = arith.constant 1 : index
      %c0_202 = arith.constant 0 : index
      %c0_203 = arith.constant 0 : index
      %294 = vector.load %arg18[%c1_201, %c0_202, %c0_203] : memref<4x8x8xf32, #tpu.memory_space<vmem>>, vector<1x8x8xf32>
      %295 = vector.shape_cast %294 : vector<1x8x8xf32> to vector<8x8xf32>
      %296 = vector.broadcast %281 : vector<8x1xf32> to vector<8x8xf32>
      %297 = arith.mulf %296, %295 : vector<8x8xf32>
      %cst_204 = arith.constant dense<0.000000e+00> : vector<8x8xf32>
      %298 = tpu.matmul %284, %271, %cst_204 {dimension_numbers = #tpu.dot_dimension_numbers<[1], [0], [0], [1], [0, 0, 1, 1], [], []>} : vector<8x8xf32>, vector<8x8xf32>, vector<8x8xf32> -> vector<8x8xf32>
      %299 = arith.addf %297, %298 : vector<8x8xf32>
      %c1_205 = arith.constant 1 : index
      %c0_206 = arith.constant 0 : index
      %c0_207 = arith.constant 0 : index
      %300 = vector.load %arg18[%c1_205, %c0_206, %c0_207] : memref<4x8x8xf32, #tpu.memory_space<vmem>>, vector<1x8x8xf32>
      %301 = vector.shape_cast %300 : vector<1x8x8xf32> to vector<8x8xf32>
      %302 = vector.shape_cast %299 : vector<8x8xf32> to vector<1x8x8xf32>
      tpu.vector_store %arg18[%c1_205, %c0_206, %c0_207], %302 {strides = array<i32>} : memref<4x8x8xf32, #tpu.memory_space<vmem>>, vector<1x8x8xf32>,
      %c1_208 = arith.constant 1 : index
      %c0_209 = arith.constant 0 : index
      %c0_210 = arith.constant 0 : index
      %303 = vector.load %arg16[%c1_208, %c0_209, %c0_210] : memref<4x8x1xf32, #tpu.memory_space<vmem>>, vector<1x8x1xf32>
      %304 = vector.shape_cast %303 : vector<1x8x1xf32> to vector<8x1xf32>
      %305 = vector.shape_cast %279 : vector<8x1xf32> to vector<1x8x1xf32>
      tpu.vector_store %arg16[%c1_208, %c0_209, %c0_210], %305 {strides = array<i32>} : memref<4x8x1xf32, #tpu.memory_space<vmem>>, vector<1x8x1xf32>,
      %306 = vector.extract_strided_slice %231 {offsets = [0, 16], sizes = [8, 8], strides = [1, 1]} : vector<8x32xf32> to vector<8x8xf32>
      %307 = vector.extract_strided_slice %233 {offsets = [0, 16], sizes = [8, 8], strides = [1, 1]} : vector<8x32xf32> to vector<8x8xf32>
      %c2_211 = arith.constant 2 : index
      %c0_212 = arith.constant 0 : index
      %c0_213 = arith.constant 0 : index
      %308 = vector.load %arg15[%c2_211, %c0_212, %c0_213] : memref<4x8x8xf32, #tpu.memory_space<vmem>>, vector<1x8x8xf32>
      %309 = vector.shape_cast %308 : vector<1x8x8xf32> to vector<8x8xf32>
      %cst_214 = arith.constant dense<0.000000e+00> : vector<8x8xf32>
      %310 = tpu.matmul %309, %306, %cst_214 {dimension_numbers = #tpu.dot_dimension_numbers<[1], [1], [0], [0], [0, 0, 1, 0], [], []>} : vector<8x8xf32>, vector<8x8xf32>, vector<8x8xf32> -> vector<8x8xf32>
      %c2_215 = arith.constant 2 : index
      %c0_216 = arith.constant 0 : index
      %c0_217 = arith.constant 0 : index
      %311 = vector.load %arg16[%c2_215, %c0_216, %c0_217] : memref<4x8x1xf32, #tpu.memory_space<vmem>>, vector<1x8x1xf32>
      %312 = vector.shape_cast %311 : vector<1x8x1xf32> to vector<8x1xf32>
      %cst_218 = arith.constant dense<0xFF800000> : vector<8xf32>
      %313 = vector.multi_reduction <maximumf>, %310, %cst_218 [1] : vector<8x8xf32> to vector<8xf32>
      %314 = vector.shape_cast %313 : vector<8xf32> to vector<8x1xf32>
      %315 = arith.maximumf %312, %314 : vector<8x1xf32>
      %316 = arith.subf %312, %315 : vector<8x1xf32>
      %317 = math.exp %316 : vector<8x1xf32>
      %318 = vector.broadcast %315 : vector<8x1xf32> to vector<8x8xf32>
      %319 = arith.subf %310, %318 : vector<8x8xf32>
      %320 = math.exp %319 : vector<8x8xf32>
      %c2_219 = arith.constant 2 : index
      %c0_220 = arith.constant 0 : index
      %c0_221 = arith.constant 0 : index
      %321 = vector.load %arg17[%c2_219, %c0_220, %c0_221] : memref<4x8x1xf32, #tpu.memory_space<vmem>>, vector<1x8x1xf32>
      %322 = vector.shape_cast %321 : vector<1x8x1xf32> to vector<8x1xf32>
      %323 = arith.mulf %317, %322 : vector<8x1xf32>
      %cst_222 = arith.constant dense<0.000000e+00> : vector<8xf32>
      %324 = vector.multi_reduction <add>, %320, %cst_222 [1] : vector<8x8xf32> to vector<8xf32>
      %325 = vector.shape_cast %324 : vector<8xf32> to vector<8x1xf32>
      %326 = arith.addf %323, %325 : vector<8x1xf32>
      %c2_223 = arith.constant 2 : index
      %c0_224 = arith.constant 0 : index
      %c0_225 = arith.constant 0 : index
      %327 = vector.load %arg17[%c2_223, %c0_224, %c0_225] : memref<4x8x1xf32, #tpu.memory_space<vmem>>, vector<1x8x1xf32>
      %328 = vector.shape_cast %327 : vector<1x8x1xf32> to vector<8x1xf32>
      %329 = vector.shape_cast %326 : vector<8x1xf32> to vector<1x8x1xf32>
      tpu.vector_store %arg17[%c2_223, %c0_224, %c0_225], %329 {strides = array<i32>} : memref<4x8x1xf32, #tpu.memory_space<vmem>>, vector<1x8x1xf32>,
      %c2_226 = arith.constant 2 : index
      %c0_227 = arith.constant 0 : index
      %c0_228 = arith.constant 0 : index
      %330 = vector.load %arg18[%c2_226, %c0_227, %c0_228] : memref<4x8x8xf32, #tpu.memory_space<vmem>>, vector<1x8x8xf32>
      %331 = vector.shape_cast %330 : vector<1x8x8xf32> to vector<8x8xf32>
      %332 = vector.broadcast %317 : vector<8x1xf32> to vector<8x8xf32>
      %333 = arith.mulf %332, %331 : vector<8x8xf32>
      %cst_229 = arith.constant dense<0.000000e+00> : vector<8x8xf32>
      %334 = tpu.matmul %320, %307, %cst_229 {dimension_numbers = #tpu.dot_dimension_numbers<[1], [0], [0], [1], [0, 0, 1, 1], [], []>} : vector<8x8xf32>, vector<8x8xf32>, vector<8x8xf32> -> vector<8x8xf32>
      %335 = arith.addf %333, %334 : vector<8x8xf32>
      %c2_230 = arith.constant 2 : index
      %c0_231 = arith.constant 0 : index
      %c0_232 = arith.constant 0 : index
      %336 = vector.load %arg18[%c2_230, %c0_231, %c0_232] : memref<4x8x8xf32, #tpu.memory_space<vmem>>, vector<1x8x8xf32>
      %337 = vector.shape_cast %336 : vector<1x8x8xf32> to vector<8x8xf32>
      %338 = vector.shape_cast %335 : vector<8x8xf32> to vector<1x8x8xf32>
      tpu.vector_store %arg18[%c2_230, %c0_231, %c0_232], %338 {strides = array<i32>} : memref<4x8x8xf32, #tpu.memory_space<vmem>>, vector<1x8x8xf32>,
      %c2_233 = arith.constant 2 : index
      %c0_234 = arith.constant 0 : index
      %c0_235 = arith.constant 0 : index
      %339 = vector.load %arg16[%c2_233, %c0_234, %c0_235] : memref<4x8x1xf32, #tpu.memory_space<vmem>>, vector<1x8x1xf32>
      %340 = vector.shape_cast %339 : vector<1x8x1xf32> to vector<8x1xf32>
      %341 = vector.shape_cast %315 : vector<8x1xf32> to vector<1x8x1xf32>
      tpu.vector_store %arg16[%c2_233, %c0_234, %c0_235], %341 {strides = array<i32>} : memref<4x8x1xf32, #tpu.memory_space<vmem>>, vector<1x8x1xf32>,
      %342 = vector.extract_strided_slice %231 {offsets = [0, 24], sizes = [8, 8], strides = [1, 1]} : vector<8x32xf32> to vector<8x8xf32>
      %343 = vector.extract_strided_slice %233 {offsets = [0, 24], sizes = [8, 8], strides = [1, 1]} : vector<8x32xf32> to vector<8x8xf32>
      %c3_236 = arith.constant 3 : index
      %c0_237 = arith.constant 0 : index
      %c0_238 = arith.constant 0 : index
      %344 = vector.load %arg15[%c3_236, %c0_237, %c0_238] : memref<4x8x8xf32, #tpu.memory_space<vmem>>, vector<1x8x8xf32>
      %345 = vector.shape_cast %344 : vector<1x8x8xf32> to vector<8x8xf32>
      %cst_239 = arith.constant dense<0.000000e+00> : vector<8x8xf32>
      %346 = tpu.matmul %345, %342, %cst_239 {dimension_numbers = #tpu.dot_dimension_numbers<[1], [1], [0], [0], [0, 0, 1, 0], [], []>} : vector<8x8xf32>, vector<8x8xf32>, vector<8x8xf32> -> vector<8x8xf32>
      %c3_240 = arith.constant 3 : index
      %c0_241 = arith.constant 0 : index
      %c0_242 = arith.constant 0 : index
      %347 = vector.load %arg16[%c3_240, %c0_241, %c0_242] : memref<4x8x1xf32, #tpu.memory_space<vmem>>, vector<1x8x1xf32>
      %348 = vector.shape_cast %347 : vector<1x8x1xf32> to vector<8x1xf32>
      %cst_243 = arith.constant dense<0xFF800000> : vector<8xf32>
      %349 = vector.multi_reduction <maximumf>, %346, %cst_243 [1] : vector<8x8xf32> to vector<8xf32>
      %350 = vector.shape_cast %349 : vector<8xf32> to vector<8x1xf32>
      %351 = arith.maximumf %348, %350 : vector<8x1xf32>
      %352 = arith.subf %348, %351 : vector<8x1xf32>
      %353 = math.exp %352 : vector<8x1xf32>
      %354 = vector.broadcast %351 : vector<8x1xf32> to vector<8x8xf32>
      %355 = arith.subf %346, %354 : vector<8x8xf32>
      %356 = math.exp %355 : vector<8x8xf32>
      %c3_244 = arith.constant 3 : index
      %c0_245 = arith.constant 0 : index
      %c0_246 = arith.constant 0 : index
      %357 = vector.load %arg17[%c3_244, %c0_245, %c0_246] : memref<4x8x1xf32, #tpu.memory_space<vmem>>, vector<1x8x1xf32>
      %358 = vector.shape_cast %357 : vector<1x8x1xf32> to vector<8x1xf32>
      %359 = arith.mulf %353, %358 : vector<8x1xf32>
      %cst_247 = arith.constant dense<0.000000e+00> : vector<8xf32>
      %360 = vector.multi_reduction <add>, %356, %cst_247 [1] : vector<8x8xf32> to vector<8xf32>
      %361 = vector.shape_cast %360 : vector<8xf32> to vector<8x1xf32>
      %362 = arith.addf %359, %361 : vector<8x1xf32>
      %c3_248 = arith.constant 3 : index
      %c0_249 = arith.constant 0 : index
      %c0_250 = arith.constant 0 : index
      %363 = vector.load %arg17[%c3_248, %c0_249, %c0_250] : memref<4x8x1xf32, #tpu.memory_space<vmem>>, vector<1x8x1xf32>
      %364 = vector.shape_cast %363 : vector<1x8x1xf32> to vector<8x1xf32>
      %365 = vector.shape_cast %362 : vector<8x1xf32> to vector<1x8x1xf32>
      tpu.vector_store %arg17[%c3_248, %c0_249, %c0_250], %365 {strides = array<i32>} : memref<4x8x1xf32, #tpu.memory_space<vmem>>, vector<1x8x1xf32>,
      %c3_251 = arith.constant 3 : index
      %c0_252 = arith.constant 0 : index
      %c0_253 = arith.constant 0 : index
      %366 = vector.load %arg18[%c3_251, %c0_252, %c0_253] : memref<4x8x8xf32, #tpu.memory_space<vmem>>, vector<1x8x8xf32>
      %367 = vector.shape_cast %366 : vector<1x8x8xf32> to vector<8x8xf32>
      %368 = vector.broadcast %353 : vector<8x1xf32> to vector<8x8xf32>
      %369 = arith.mulf %368, %367 : vector<8x8xf32>
      %cst_254 = arith.constant dense<0.000000e+00> : vector<8x8xf32>
      %370 = tpu.matmul %356, %343, %cst_254 {dimension_numbers = #tpu.dot_dimension_numbers<[1], [0], [0], [1], [0, 0, 1, 1], [], []>} : vector<8x8xf32>, vector<8x8xf32>, vector<8x8xf32> -> vector<8x8xf32>
      %371 = arith.addf %369, %370 : vector<8x8xf32>
      %c3_255 = arith.constant 3 : index
      %c0_256 = arith.constant 0 : index
      %c0_257 = arith.constant 0 : index
      %372 = vector.load %arg18[%c3_255, %c0_256, %c0_257] : memref<4x8x8xf32, #tpu.memory_space<vmem>>, vector<1x8x8xf32>
      %373 = vector.shape_cast %372 : vector<1x8x8xf32> to vector<8x8xf32>
      %374 = vector.shape_cast %371 : vector<8x8xf32> to vector<1x8x8xf32>
      tpu.vector_store %arg18[%c3_255, %c0_256, %c0_257], %374 {strides = array<i32>} : memref<4x8x8xf32, #tpu.memory_space<vmem>>, vector<1x8x8xf32>,
      %c3_258 = arith.constant 3 : index
      %c0_259 = arith.constant 0 : index
      %c0_260 = arith.constant 0 : index
      %375 = vector.load %arg16[%c3_258, %c0_259, %c0_260] : memref<4x8x1xf32, #tpu.memory_space<vmem>>, vector<1x8x1xf32>
      %376 = vector.shape_cast %375 : vector<1x8x1xf32> to vector<8x1xf32>
      %377 = vector.shape_cast %351 : vector<8x1xf32> to vector<1x8x1xf32>
      tpu.vector_store %arg16[%c3_258, %c0_259, %c0_260], %377 {strides = array<i32>} : memref<4x8x1xf32, #tpu.memory_space<vmem>>, vector<1x8x1xf32>,
    } else {
    }
    %c0 = arith.constant 0 : index
    %c0_1 = arith.constant 0 : index
    %3 = vector.load %arg6[%c0, %c0_1] : memref<1x32xf32, #tpu.memory_space<vmem>>, vector<1x32xf32>
    %c0_2 = arith.constant 0 : index
    %c0_3 = arith.constant 0 : index
    %4 = vector.load %arg7[%c0_2, %c0_3] : memref<1x32xf32, #tpu.memory_space<vmem>>, vector<1x32xf32>
    %c0_4 = arith.constant 0 : index
    %c0_5 = arith.constant 0 : index
    %c0_6 = arith.constant 0 : index
    %5 = vector.load %arg5[%c0_4, %c0_5, %c0_6] : memref<1x16x32xf32, #tpu.memory_space<vmem>>, vector<1x16x32xf32>
    %6 = vector.shape_cast %5 : vector<1x16x32xf32> to vector<16x32xf32>
    %cst = arith.constant dense<0.000000e+00> : vector<16xf32>
    %7 = vector.multi_reduction <add>, %6, %cst [1] : vector<16x32xf32> to vector<16xf32>
    %8 = vector.shape_cast %7 : vector<16xf32> to vector<16x1xf32>
    %cst_7 = arith.constant 3.200000e+01 : f32
    %9 = vector.broadcast %cst_7 : f32 to vector<16x1xf32>
    %10 = arith.divf %8, %9 : vector<16x1xf32>
    %11 = arith.mulf %6, %6 : vector<16x32xf32>
    %cst_8 = arith.constant dense<0.000000e+00> : vector<16xf32>
    %12 = vector.multi_reduction <add>, %11, %cst_8 [1] : vector<16x32xf32> to vector<16xf32>
    %13 = vector.shape_cast %12 : vector<16xf32> to vector<16x1xf32>
    %cst_9 = arith.constant 3.200000e+01 : f32
    %14 = vector.broadcast %cst_9 : f32 to vector<16x1xf32>
    %15 = arith.divf %13, %14 : vector<16x1xf32>
    %16 = arith.mulf %10, %10 : vector<16x1xf32>
    %17 = arith.subf %15, %16 : vector<16x1xf32>
    %18 = vector.broadcast %10 : vector<16x1xf32> to vector<16x32xf32>
    %19 = arith.subf %6, %18 : vector<16x32xf32>
    %cst_10 = arith.constant 9.99999974E-6 : f32
    %20 = vector.broadcast %cst_10 : f32 to vector<16x1xf32>
    %21 = arith.addf %17, %20 : vector<16x1xf32>
    %22 = math.rsqrt %21 : vector<16x1xf32>
    %23 = vector.broadcast %22 : vector<16x1xf32> to vector<16x32xf32>
    %24 = arith.mulf %19, %23 : vector<16x32xf32>
    %25 = vector.broadcast %3 : vector<1x32xf32> to vector<16x32xf32>
    %26 = arith.mulf %24, %25 : vector<16x32xf32>
    %27 = vector.broadcast %4 : vector<1x32xf32> to vector<16x32xf32>
    %28 = arith.addf %26, %27 : vector<16x32xf32>
    %c0_11 = arith.constant 0 : index
    %c0_12 = arith.constant 0 : index
    %29 = vector.load %arg11[%c0_11, %c0_12] : memref<32x32xf32, #tpu.memory_space<vmem>>, vector<32x32xf32>
    %cst_13 = arith.constant dense<0.000000e+00> : vector<16x32xf32>
    %30 = tpu.matmul %28, %29, %cst_13 {dimension_numbers = #tpu.dot_dimension_numbers<[1], [0], [0], [1], [0, 0, 1, 1], [], []>} : vector<16x32xf32>, vector<32x32xf32>, vector<16x32xf32> -> vector<16x32xf32>
    %c0_14 = arith.constant 0 : index
    %c0_15 = arith.constant 0 : index
    %31 = vector.load %arg12[%c0_14, %c0_15] : memref<32x32xf32, #tpu.memory_space<vmem>>, vector<32x32xf32>
    %cst_16 = arith.constant dense<0.000000e+00> : vector<16x32xf32>
    %32 = tpu.matmul %28, %31, %cst_16 {dimension_numbers = #tpu.dot_dimension_numbers<[1], [0], [0], [1], [0, 0, 1, 1], [], []>} : vector<16x32xf32>, vector<32x32xf32>, vector<16x32xf32> -> vector<16x32xf32>
    %33 = vector.extract_strided_slice %30 {offsets = [0, 0], sizes = [16, 8], strides = [1, 1]} : vector<16x32xf32> to vector<16x8xf32>
    %34 = vector.extract_strided_slice %32 {offsets = [0, 0], sizes = [16, 8], strides = [1, 1]} : vector<16x32xf32> to vector<16x8xf32>
    %c0_17 = arith.constant 0 : index
    %c0_18 = arith.constant 0 : index
    %c0_19 = arith.constant 0 : index
    %35 = vector.load %arg15[%c0_17, %c0_18, %c0_19] : memref<4x8x8xf32, #tpu.memory_space<vmem>>, vector<1x8x8xf32>
    %36 = vector.shape_cast %35 : vector<1x8x8xf32> to vector<8x8xf32>
    %cst_20 = arith.constant dense<0.000000e+00> : vector<8x16xf32>
    %37 = tpu.matmul %36, %33, %cst_20 {dimension_numbers = #tpu.dot_dimension_numbers<[1], [1], [0], [0], [0, 0, 1, 0], [], []>} : vector<8x8xf32>, vector<16x8xf32>, vector<8x16xf32> -> vector<8x16xf32>
    %c0_21 = arith.constant 0 : index
    %c0_22 = arith.constant 0 : index
    %c0_23 = arith.constant 0 : index
    %38 = vector.load %arg16[%c0_21, %c0_22, %c0_23] : memref<4x8x1xf32, #tpu.memory_space<vmem>>, vector<1x8x1xf32>
    %39 = vector.shape_cast %38 : vector<1x8x1xf32> to vector<8x1xf32>
    %cst_24 = arith.constant dense<0xFF800000> : vector<8xf32>
    %40 = vector.multi_reduction <maximumf>, %37, %cst_24 [1] : vector<8x16xf32> to vector<8xf32>
    %41 = vector.shape_cast %40 : vector<8xf32> to vector<8x1xf32>
    %42 = arith.maximumf %39, %41 : vector<8x1xf32>
    %43 = arith.subf %39, %42 : vector<8x1xf32>
    %44 = math.exp %43 : vector<8x1xf32>
    %45 = vector.broadcast %42 : vector<8x1xf32> to vector<8x16xf32>
    %46 = arith.subf %37, %45 : vector<8x16xf32>
    %47 = math.exp %46 : vector<8x16xf32>
    %c0_25 = arith.constant 0 : index
    %c0_26 = arith.constant 0 : index
    %c0_27 = arith.constant 0 : index
    %48 = vector.load %arg17[%c0_25, %c0_26, %c0_27] : memref<4x8x1xf32, #tpu.memory_space<vmem>>, vector<1x8x1xf32>
    %49 = vector.shape_cast %48 : vector<1x8x1xf32> to vector<8x1xf32>
    %50 = arith.mulf %44, %49 : vector<8x1xf32>
    %cst_28 = arith.constant dense<0.000000e+00> : vector<8xf32>
    %51 = vector.multi_reduction <add>, %47, %cst_28 [1] : vector<8x16xf32> to vector<8xf32>
    %52 = vector.shape_cast %51 : vector<8xf32> to vector<8x1xf32>
    %53 = arith.addf %50, %52 : vector<8x1xf32>
    %c0_29 = arith.constant 0 : index
    %c0_30 = arith.constant 0 : index
    %c0_31 = arith.constant 0 : index
    %54 = vector.load %arg17[%c0_29, %c0_30, %c0_31] : memref<4x8x1xf32, #tpu.memory_space<vmem>>, vector<1x8x1xf32>
    %55 = vector.shape_cast %54 : vector<1x8x1xf32> to vector<8x1xf32>
    %56 = vector.shape_cast %53 : vector<8x1xf32> to vector<1x8x1xf32>
    tpu.vector_store %arg17[%c0_29, %c0_30, %c0_31], %56 {strides = array<i32>} : memref<4x8x1xf32, #tpu.memory_space<vmem>>, vector<1x8x1xf32>,
    %c0_32 = arith.constant 0 : index
    %c0_33 = arith.constant 0 : index
    %c0_34 = arith.constant 0 : index
    %57 = vector.load %arg18[%c0_32, %c0_33, %c0_34] : memref<4x8x8xf32, #tpu.memory_space<vmem>>, vector<1x8x8xf32>
    %58 = vector.shape_cast %57 : vector<1x8x8xf32> to vector<8x8xf32>
    %59 = vector.broadcast %44 : vector<8x1xf32> to vector<8x8xf32>
    %60 = arith.mulf %59, %58 : vector<8x8xf32>
    %cst_35 = arith.constant dense<0.000000e+00> : vector<8x8xf32>
    %61 = tpu.matmul %47, %34, %cst_35 {dimension_numbers = #tpu.dot_dimension_numbers<[1], [0], [0], [1], [0, 0, 1, 1], [], []>} : vector<8x16xf32>, vector<16x8xf32>, vector<8x8xf32> -> vector<8x8xf32>
    %62 = arith.addf %60, %61 : vector<8x8xf32>
    %c0_36 = arith.constant 0 : index
    %c0_37 = arith.constant 0 : index
    %c0_38 = arith.constant 0 : index
    %63 = vector.load %arg18[%c0_36, %c0_37, %c0_38] : memref<4x8x8xf32, #tpu.memory_space<vmem>>, vector<1x8x8xf32>
    %64 = vector.shape_cast %63 : vector<1x8x8xf32> to vector<8x8xf32>
    %65 = vector.shape_cast %62 : vector<8x8xf32> to vector<1x8x8xf32>
    tpu.vector_store %arg18[%c0_36, %c0_37, %c0_38], %65 {strides = array<i32>} : memref<4x8x8xf32, #tpu.memory_space<vmem>>, vector<1x8x8xf32>,
    %c0_39 = arith.constant 0 : index
    %c0_40 = arith.constant 0 : index
    %c0_41 = arith.constant 0 : index
    %66 = vector.load %arg16[%c0_39, %c0_40, %c0_41] : memref<4x8x1xf32, #tpu.memory_space<vmem>>, vector<1x8x1xf32>
    %67 = vector.shape_cast %66 : vector<1x8x1xf32> to vector<8x1xf32>
    %68 = vector.shape_cast %42 : vector<8x1xf32> to vector<1x8x1xf32>
    tpu.vector_store %arg16[%c0_39, %c0_40, %c0_41], %68 {strides = array<i32>} : memref<4x8x1xf32, #tpu.memory_space<vmem>>, vector<1x8x1xf32>,
    %69 = vector.extract_strided_slice %30 {offsets = [0, 8], sizes = [16, 8], strides = [1, 1]} : vector<16x32xf32> to vector<16x8xf32>
    %70 = vector.extract_strided_slice %32 {offsets = [0, 8], sizes = [16, 8], strides = [1, 1]} : vector<16x32xf32> to vector<16x8xf32>
    %c1 = arith.constant 1 : index
    %c0_42 = arith.constant 0 : index
    %c0_43 = arith.constant 0 : index
    %71 = vector.load %arg15[%c1, %c0_42, %c0_43] : memref<4x8x8xf32, #tpu.memory_space<vmem>>, vector<1x8x8xf32>
    %72 = vector.shape_cast %71 : vector<1x8x8xf32> to vector<8x8xf32>
    %cst_44 = arith.constant dense<0.000000e+00> : vector<8x16xf32>
    %73 = tpu.matmul %72, %69, %cst_44 {dimension_numbers = #tpu.dot_dimension_numbers<[1], [1], [0], [0], [0, 0, 1, 0], [], []>} : vector<8x8xf32>, vector<16x8xf32>, vector<8x16xf32> -> vector<8x16xf32>
    %c1_45 = arith.constant 1 : index
    %c0_46 = arith.constant 0 : index
    %c0_47 = arith.constant 0 : index
    %74 = vector.load %arg16[%c1_45, %c0_46, %c0_47] : memref<4x8x1xf32, #tpu.memory_space<vmem>>, vector<1x8x1xf32>
    %75 = vector.shape_cast %74 : vector<1x8x1xf32> to vector<8x1xf32>
    %cst_48 = arith.constant dense<0xFF800000> : vector<8xf32>
    %76 = vector.multi_reduction <maximumf>, %73, %cst_48 [1] : vector<8x16xf32> to vector<8xf32>
    %77 = vector.shape_cast %76 : vector<8xf32> to vector<8x1xf32>
    %78 = arith.maximumf %75, %77 : vector<8x1xf32>
    %79 = arith.subf %75, %78 : vector<8x1xf32>
    %80 = math.exp %79 : vector<8x1xf32>
    %81 = vector.broadcast %78 : vector<8x1xf32> to vector<8x16xf32>
    %82 = arith.subf %73, %81 : vector<8x16xf32>
    %83 = math.exp %82 : vector<8x16xf32>
    %c1_49 = arith.constant 1 : index
    %c0_50 = arith.constant 0 : index
    %c0_51 = arith.constant 0 : index
    %84 = vector.load %arg17[%c1_49, %c0_50, %c0_51] : memref<4x8x1xf32, #tpu.memory_space<vmem>>, vector<1x8x1xf32>
    %85 = vector.shape_cast %84 : vector<1x8x1xf32> to vector<8x1xf32>
    %86 = arith.mulf %80, %85 : vector<8x1xf32>
    %cst_52 = arith.constant dense<0.000000e+00> : vector<8xf32>
    %87 = vector.multi_reduction <add>, %83, %cst_52 [1] : vector<8x16xf32> to vector<8xf32>
    %88 = vector.shape_cast %87 : vector<8xf32> to vector<8x1xf32>
    %89 = arith.addf %86, %88 : vector<8x1xf32>
    %c1_53 = arith.constant 1 : index
    %c0_54 = arith.constant 0 : index
    %c0_55 = arith.constant 0 : index
    %90 = vector.load %arg17[%c1_53, %c0_54, %c0_55] : memref<4x8x1xf32, #tpu.memory_space<vmem>>, vector<1x8x1xf32>
    %91 = vector.shape_cast %90 : vector<1x8x1xf32> to vector<8x1xf32>
    %92 = vector.shape_cast %89 : vector<8x1xf32> to vector<1x8x1xf32>
    tpu.vector_store %arg17[%c1_53, %c0_54, %c0_55], %92 {strides = array<i32>} : memref<4x8x1xf32, #tpu.memory_space<vmem>>, vector<1x8x1xf32>,
    %c1_56 = arith.constant 1 : index
    %c0_57 = arith.constant 0 : index
    %c0_58 = arith.constant 0 : index
    %93 = vector.load %arg18[%c1_56, %c0_57, %c0_58] : memref<4x8x8xf32, #tpu.memory_space<vmem>>, vector<1x8x8xf32>
    %94 = vector.shape_cast %93 : vector<1x8x8xf32> to vector<8x8xf32>
    %95 = vector.broadcast %80 : vector<8x1xf32> to vector<8x8xf32>
    %96 = arith.mulf %95, %94 : vector<8x8xf32>
    %cst_59 = arith.constant dense<0.000000e+00> : vector<8x8xf32>
    %97 = tpu.matmul %83, %70, %cst_59 {dimension_numbers = #tpu.dot_dimension_numbers<[1], [0], [0], [1], [0, 0, 1, 1], [], []>} : vector<8x16xf32>, vector<16x8xf32>, vector<8x8xf32> -> vector<8x8xf32>
    %98 = arith.addf %96, %97 : vector<8x8xf32>
    %c1_60 = arith.constant 1 : index
    %c0_61 = arith.constant 0 : index
    %c0_62 = arith.constant 0 : index
    %99 = vector.load %arg18[%c1_60, %c0_61, %c0_62] : memref<4x8x8xf32, #tpu.memory_space<vmem>>, vector<1x8x8xf32>
    %100 = vector.shape_cast %99 : vector<1x8x8xf32> to vector<8x8xf32>
    %101 = vector.shape_cast %98 : vector<8x8xf32> to vector<1x8x8xf32>
    tpu.vector_store %arg18[%c1_60, %c0_61, %c0_62], %101 {strides = array<i32>} : memref<4x8x8xf32, #tpu.memory_space<vmem>>, vector<1x8x8xf32>,
    %c1_63 = arith.constant 1 : index
    %c0_64 = arith.constant 0 : index
    %c0_65 = arith.constant 0 : index
    %102 = vector.load %arg16[%c1_63, %c0_64, %c0_65] : memref<4x8x1xf32, #tpu.memory_space<vmem>>, vector<1x8x1xf32>
    %103 = vector.shape_cast %102 : vector<1x8x1xf32> to vector<8x1xf32>
    %104 = vector.shape_cast %78 : vector<8x1xf32> to vector<1x8x1xf32>
    tpu.vector_store %arg16[%c1_63, %c0_64, %c0_65], %104 {strides = array<i32>} : memref<4x8x1xf32, #tpu.memory_space<vmem>>, vector<1x8x1xf32>,
    %105 = vector.extract_strided_slice %30 {offsets = [0, 16], sizes = [16, 8], strides = [1, 1]} : vector<16x32xf32> to vector<16x8xf32>
    %106 = vector.extract_strided_slice %32 {offsets = [0, 16], sizes = [16, 8], strides = [1, 1]} : vector<16x32xf32> to vector<16x8xf32>
    %c2 = arith.constant 2 : index
    %c0_66 = arith.constant 0 : index
    %c0_67 = arith.constant 0 : index
    %107 = vector.load %arg15[%c2, %c0_66, %c0_67] : memref<4x8x8xf32, #tpu.memory_space<vmem>>, vector<1x8x8xf32>
    %108 = vector.shape_cast %107 : vector<1x8x8xf32> to vector<8x8xf32>
    %cst_68 = arith.constant dense<0.000000e+00> : vector<8x16xf32>
    %109 = tpu.matmul %108, %105, %cst_68 {dimension_numbers = #tpu.dot_dimension_numbers<[1], [1], [0], [0], [0, 0, 1, 0], [], []>} : vector<8x8xf32>, vector<16x8xf32>, vector<8x16xf32> -> vector<8x16xf32>
    %c2_69 = arith.constant 2 : index
    %c0_70 = arith.constant 0 : index
    %c0_71 = arith.constant 0 : index
    %110 = vector.load %arg16[%c2_69, %c0_70, %c0_71] : memref<4x8x1xf32, #tpu.memory_space<vmem>>, vector<1x8x1xf32>
    %111 = vector.shape_cast %110 : vector<1x8x1xf32> to vector<8x1xf32>
    %cst_72 = arith.constant dense<0xFF800000> : vector<8xf32>
    %112 = vector.multi_reduction <maximumf>, %109, %cst_72 [1] : vector<8x16xf32> to vector<8xf32>
    %113 = vector.shape_cast %112 : vector<8xf32> to vector<8x1xf32>
    %114 = arith.maximumf %111, %113 : vector<8x1xf32>
    %115 = arith.subf %111, %114 : vector<8x1xf32>
    %116 = math.exp %115 : vector<8x1xf32>
    %117 = vector.broadcast %114 : vector<8x1xf32> to vector<8x16xf32>
    %118 = arith.subf %109, %117 : vector<8x16xf32>
    %119 = math.exp %118 : vector<8x16xf32>
    %c2_73 = arith.constant 2 : index
    %c0_74 = arith.constant 0 : index
    %c0_75 = arith.constant 0 : index
    %120 = vector.load %arg17[%c2_73, %c0_74, %c0_75] : memref<4x8x1xf32, #tpu.memory_space<vmem>>, vector<1x8x1xf32>
    %121 = vector.shape_cast %120 : vector<1x8x1xf32> to vector<8x1xf32>
    %122 = arith.mulf %116, %121 : vector<8x1xf32>
    %cst_76 = arith.constant dense<0.000000e+00> : vector<8xf32>
    %123 = vector.multi_reduction <add>, %119, %cst_76 [1] : vector<8x16xf32> to vector<8xf32>
    %124 = vector.shape_cast %123 : vector<8xf32> to vector<8x1xf32>
    %125 = arith.addf %122, %124 : vector<8x1xf32>
    %c2_77 = arith.constant 2 : index
    %c0_78 = arith.constant 0 : index
    %c0_79 = arith.constant 0 : index
    %126 = vector.load %arg17[%c2_77, %c0_78, %c0_79] : memref<4x8x1xf32, #tpu.memory_space<vmem>>, vector<1x8x1xf32>
    %127 = vector.shape_cast %126 : vector<1x8x1xf32> to vector<8x1xf32>
    %128 = vector.shape_cast %125 : vector<8x1xf32> to vector<1x8x1xf32>
    tpu.vector_store %arg17[%c2_77, %c0_78, %c0_79], %128 {strides = array<i32>} : memref<4x8x1xf32, #tpu.memory_space<vmem>>, vector<1x8x1xf32>,
    %c2_80 = arith.constant 2 : index
    %c0_81 = arith.constant 0 : index
    %c0_82 = arith.constant 0 : index
    %129 = vector.load %arg18[%c2_80, %c0_81, %c0_82] : memref<4x8x8xf32, #tpu.memory_space<vmem>>, vector<1x8x8xf32>
    %130 = vector.shape_cast %129 : vector<1x8x8xf32> to vector<8x8xf32>
    %131 = vector.broadcast %116 : vector<8x1xf32> to vector<8x8xf32>
    %132 = arith.mulf %131, %130 : vector<8x8xf32>
    %cst_83 = arith.constant dense<0.000000e+00> : vector<8x8xf32>
    %133 = tpu.matmul %119, %106, %cst_83 {dimension_numbers = #tpu.dot_dimension_numbers<[1], [0], [0], [1], [0, 0, 1, 1], [], []>} : vector<8x16xf32>, vector<16x8xf32>, vector<8x8xf32> -> vector<8x8xf32>
    %134 = arith.addf %132, %133 : vector<8x8xf32>
    %c2_84 = arith.constant 2 : index
    %c0_85 = arith.constant 0 : index
    %c0_86 = arith.constant 0 : index
    %135 = vector.load %arg18[%c2_84, %c0_85, %c0_86] : memref<4x8x8xf32, #tpu.memory_space<vmem>>, vector<1x8x8xf32>
    %136 = vector.shape_cast %135 : vector<1x8x8xf32> to vector<8x8xf32>
    %137 = vector.shape_cast %134 : vector<8x8xf32> to vector<1x8x8xf32>
    tpu.vector_store %arg18[%c2_84, %c0_85, %c0_86], %137 {strides = array<i32>} : memref<4x8x8xf32, #tpu.memory_space<vmem>>, vector<1x8x8xf32>,
    %c2_87 = arith.constant 2 : index
    %c0_88 = arith.constant 0 : index
    %c0_89 = arith.constant 0 : index
    %138 = vector.load %arg16[%c2_87, %c0_88, %c0_89] : memref<4x8x1xf32, #tpu.memory_space<vmem>>, vector<1x8x1xf32>
    %139 = vector.shape_cast %138 : vector<1x8x1xf32> to vector<8x1xf32>
    %140 = vector.shape_cast %114 : vector<8x1xf32> to vector<1x8x1xf32>
    tpu.vector_store %arg16[%c2_87, %c0_88, %c0_89], %140 {strides = array<i32>} : memref<4x8x1xf32, #tpu.memory_space<vmem>>, vector<1x8x1xf32>,
    %141 = vector.extract_strided_slice %30 {offsets = [0, 24], sizes = [16, 8], strides = [1, 1]} : vector<16x32xf32> to vector<16x8xf32>
    %142 = vector.extract_strided_slice %32 {offsets = [0, 24], sizes = [16, 8], strides = [1, 1]} : vector<16x32xf32> to vector<16x8xf32>
    %c3 = arith.constant 3 : index
    %c0_90 = arith.constant 0 : index
    %c0_91 = arith.constant 0 : index
    %143 = vector.load %arg15[%c3, %c0_90, %c0_91] : memref<4x8x8xf32, #tpu.memory_space<vmem>>, vector<1x8x8xf32>
    %144 = vector.shape_cast %143 : vector<1x8x8xf32> to vector<8x8xf32>
    %cst_92 = arith.constant dense<0.000000e+00> : vector<8x16xf32>
    %145 = tpu.matmul %144, %141, %cst_92 {dimension_numbers = #tpu.dot_dimension_numbers<[1], [1], [0], [0], [0, 0, 1, 0], [], []>} : vector<8x8xf32>, vector<16x8xf32>, vector<8x16xf32> -> vector<8x16xf32>
    %c3_93 = arith.constant 3 : index
    %c0_94 = arith.constant 0 : index
    %c0_95 = arith.constant 0 : index
    %146 = vector.load %arg16[%c3_93, %c0_94, %c0_95] : memref<4x8x1xf32, #tpu.memory_space<vmem>>, vector<1x8x1xf32>
    %147 = vector.shape_cast %146 : vector<1x8x1xf32> to vector<8x1xf32>
    %cst_96 = arith.constant dense<0xFF800000> : vector<8xf32>
    %148 = vector.multi_reduction <maximumf>, %145, %cst_96 [1] : vector<8x16xf32> to vector<8xf32>
    %149 = vector.shape_cast %148 : vector<8xf32> to vector<8x1xf32>
    %150 = arith.maximumf %147, %149 : vector<8x1xf32>
    %151 = arith.subf %147, %150 : vector<8x1xf32>
    %152 = math.exp %151 : vector<8x1xf32>
    %153 = vector.broadcast %150 : vector<8x1xf32> to vector<8x16xf32>
    %154 = arith.subf %145, %153 : vector<8x16xf32>
    %155 = math.exp %154 : vector<8x16xf32>
    %c3_97 = arith.constant 3 : index
    %c0_98 = arith.constant 0 : index
    %c0_99 = arith.constant 0 : index
    %156 = vector.load %arg17[%c3_97, %c0_98, %c0_99] : memref<4x8x1xf32, #tpu.memory_space<vmem>>, vector<1x8x1xf32>
    %157 = vector.shape_cast %156 : vector<1x8x1xf32> to vector<8x1xf32>
    %158 = arith.mulf %152, %157 : vector<8x1xf32>
    %cst_100 = arith.constant dense<0.000000e+00> : vector<8xf32>
    %159 = vector.multi_reduction <add>, %155, %cst_100 [1] : vector<8x16xf32> to vector<8xf32>
    %160 = vector.shape_cast %159 : vector<8xf32> to vector<8x1xf32>
    %161 = arith.addf %158, %160 : vector<8x1xf32>
    %c3_101 = arith.constant 3 : index
    %c0_102 = arith.constant 0 : index
    %c0_103 = arith.constant 0 : index
    %162 = vector.load %arg17[%c3_101, %c0_102, %c0_103] : memref<4x8x1xf32, #tpu.memory_space<vmem>>, vector<1x8x1xf32>
    %163 = vector.shape_cast %162 : vector<1x8x1xf32> to vector<8x1xf32>
    %164 = vector.shape_cast %161 : vector<8x1xf32> to vector<1x8x1xf32>
    tpu.vector_store %arg17[%c3_101, %c0_102, %c0_103], %164 {strides = array<i32>} : memref<4x8x1xf32, #tpu.memory_space<vmem>>, vector<1x8x1xf32>,
    %c3_104 = arith.constant 3 : index
    %c0_105 = arith.constant 0 : index
    %c0_106 = arith.constant 0 : index
    %165 = vector.load %arg18[%c3_104, %c0_105, %c0_106] : memref<4x8x8xf32, #tpu.memory_space<vmem>>, vector<1x8x8xf32>
    %166 = vector.shape_cast %165 : vector<1x8x8xf32> to vector<8x8xf32>
    %167 = vector.broadcast %152 : vector<8x1xf32> to vector<8x8xf32>
    %168 = arith.mulf %167, %166 : vector<8x8xf32>
    %cst_107 = arith.constant dense<0.000000e+00> : vector<8x8xf32>
    %169 = tpu.matmul %155, %142, %cst_107 {dimension_numbers = #tpu.dot_dimension_numbers<[1], [0], [0], [1], [0, 0, 1, 1], [], []>} : vector<8x16xf32>, vector<16x8xf32>, vector<8x8xf32> -> vector<8x8xf32>
    %170 = arith.addf %168, %169 : vector<8x8xf32>
    %c3_108 = arith.constant 3 : index
    %c0_109 = arith.constant 0 : index
    %c0_110 = arith.constant 0 : index
    %171 = vector.load %arg18[%c3_108, %c0_109, %c0_110] : memref<4x8x8xf32, #tpu.memory_space<vmem>>, vector<1x8x8xf32>
    %172 = vector.shape_cast %171 : vector<1x8x8xf32> to vector<8x8xf32>
    %173 = vector.shape_cast %170 : vector<8x8xf32> to vector<1x8x8xf32>
    tpu.vector_store %arg18[%c3_108, %c0_109, %c0_110], %173 {strides = array<i32>} : memref<4x8x8xf32, #tpu.memory_space<vmem>>, vector<1x8x8xf32>,
    %c3_111 = arith.constant 3 : index
    %c0_112 = arith.constant 0 : index
    %c0_113 = arith.constant 0 : index
    %174 = vector.load %arg16[%c3_111, %c0_112, %c0_113] : memref<4x8x1xf32, #tpu.memory_space<vmem>>, vector<1x8x1xf32>
    %175 = vector.shape_cast %174 : vector<1x8x1xf32> to vector<8x1xf32>
    %176 = vector.shape_cast %150 : vector<8x1xf32> to vector<1x8x1xf32>
    tpu.vector_store %arg16[%c3_111, %c0_112, %c0_113], %176 {strides = array<i32>} : memref<4x8x1xf32, #tpu.memory_space<vmem>>, vector<1x8x1xf32>,
    %c0_i32_114 = arith.constant 0 : i32
    %177 = arith.cmpi eq, %arg2, %c0_i32_114 : i32
    %178 = arith.extui %177 : i1 to i32
    %c0_i32_115 = arith.constant 0 : i32
    %179 = arith.cmpi ne, %178, %c0_i32_115 : i32
    scf.if %179 {
      %c0_116 = arith.constant 0 : index
      %c0_117 = arith.constant 0 : index
      %c0_118 = arith.constant 0 : index
      %180 = vector.load %arg17[%c0_116, %c0_117, %c0_118] : memref<4x8x1xf32, #tpu.memory_space<vmem>>, vector<1x8x1xf32>
      %181 = vector.shape_cast %180 : vector<1x8x1xf32> to vector<8x1xf32>
      %cst_119 = arith.constant 1.000000e+00 : f32
      %182 = vector.broadcast %cst_119 : f32 to vector<8x1xf32>
      %183 = arith.divf %182, %181 : vector<8x1xf32>
      %c0_120 = arith.constant 0 : index
      %c0_121 = arith.constant 0 : index
      %c0_122 = arith.constant 0 : index
      %184 = vector.load %arg18[%c0_120, %c0_121, %c0_122] : memref<4x8x8xf32, #tpu.memory_space<vmem>>, vector<1x8x8xf32>
      %185 = vector.shape_cast %184 : vector<1x8x8xf32> to vector<8x8xf32>
      %186 = vector.broadcast %183 : vector<8x1xf32> to vector<8x8xf32>
      %187 = arith.mulf %185, %186 : vector<8x8xf32>
      %c0_123 = arith.constant 0 : index
      %c0_124 = arith.constant 0 : index
      %188 = vector.load %arg19[%c0_123, %c0_124] : memref<8x32xf32, #tpu.memory_space<vmem>>, vector<8x8xf32>
      tpu.vector_store %arg19[%c0_123, %c0_124], %187 {strides = array<i32>} : memref<8x32xf32, #tpu.memory_space<vmem>>, vector<8x8xf32>,
      %c1_125 = arith.constant 1 : index
      %c0_126 = arith.constant 0 : index
      %c0_127 = arith.constant 0 : index
      %189 = vector.load %arg17[%c1_125, %c0_126, %c0_127] : memref<4x8x1xf32, #tpu.memory_space<vmem>>, vector<1x8x1xf32>
      %190 = vector.shape_cast %189 : vector<1x8x1xf32> to vector<8x1xf32>
      %cst_128 = arith.constant 1.000000e+00 : f32
      %191 = vector.broadcast %cst_128 : f32 to vector<8x1xf32>
      %192 = arith.divf %191, %190 : vector<8x1xf32>
      %c1_129 = arith.constant 1 : index
      %c0_130 = arith.constant 0 : index
      %c0_131 = arith.constant 0 : index
      %193 = vector.load %arg18[%c1_129, %c0_130, %c0_131] : memref<4x8x8xf32, #tpu.memory_space<vmem>>, vector<1x8x8xf32>
      %194 = vector.shape_cast %193 : vector<1x8x8xf32> to vector<8x8xf32>
      %195 = vector.broadcast %192 : vector<8x1xf32> to vector<8x8xf32>
      %196 = arith.mulf %194, %195 : vector<8x8xf32>
      %c0_132 = arith.constant 0 : index
      %c8 = arith.constant 8 : index
      %197 = vector.load %arg19[%c0_132, %c8] : memref<8x32xf32, #tpu.memory_space<vmem>>, vector<8x8xf32>
      tpu.vector_store %arg19[%c0_132, %c8], %196 {strides = array<i32>} : memref<8x32xf32, #tpu.memory_space<vmem>>, vector<8x8xf32>,
      %c2_133 = arith.constant 2 : index
      %c0_134 = arith.constant 0 : index
      %c0_135 = arith.constant 0 : index
      %198 = vector.load %arg17[%c2_133, %c0_134, %c0_135] : memref<4x8x1xf32, #tpu.memory_space<vmem>>, vector<1x8x1xf32>
      %199 = vector.shape_cast %198 : vector<1x8x1xf32> to vector<8x1xf32>
      %cst_136 = arith.constant 1.000000e+00 : f32
      %200 = vector.broadcast %cst_136 : f32 to vector<8x1xf32>
      %201 = arith.divf %200, %199 : vector<8x1xf32>
      %c2_137 = arith.constant 2 : index
      %c0_138 = arith.constant 0 : index
      %c0_139 = arith.constant 0 : index
      %202 = vector.load %arg18[%c2_137, %c0_138, %c0_139] : memref<4x8x8xf32, #tpu.memory_space<vmem>>, vector<1x8x8xf32>
      %203 = vector.shape_cast %202 : vector<1x8x8xf32> to vector<8x8xf32>
      %204 = vector.broadcast %201 : vector<8x1xf32> to vector<8x8xf32>
      %205 = arith.mulf %203, %204 : vector<8x8xf32>
      %c0_140 = arith.constant 0 : index
      %c16 = arith.constant 16 : index
      %206 = vector.load %arg19[%c0_140, %c16] : memref<8x32xf32, #tpu.memory_space<vmem>>, vector<8x8xf32>
      tpu.vector_store %arg19[%c0_140, %c16], %205 {strides = array<i32>} : memref<8x32xf32, #tpu.memory_space<vmem>>, vector<8x8xf32>,
      %c3_141 = arith.constant 3 : index
      %c0_142 = arith.constant 0 : index
      %c0_143 = arith.constant 0 : index
      %207 = vector.load %arg17[%c3_141, %c0_142, %c0_143] : memref<4x8x1xf32, #tpu.memory_space<vmem>>, vector<1x8x1xf32>
      %208 = vector.shape_cast %207 : vector<1x8x1xf32> to vector<8x1xf32>
      %cst_144 = arith.constant 1.000000e+00 : f32
      %209 = vector.broadcast %cst_144 : f32 to vector<8x1xf32>
      %210 = arith.divf %209, %208 : vector<8x1xf32>
      %c3_145 = arith.constant 3 : index
      %c0_146 = arith.constant 0 : index
      %c0_147 = arith.constant 0 : index
      %211 = vector.load %arg18[%c3_145, %c0_146, %c0_147] : memref<4x8x8xf32, #tpu.memory_space<vmem>>, vector<1x8x8xf32>
      %212 = vector.shape_cast %211 : vector<1x8x8xf32> to vector<8x8xf32>
      %213 = vector.broadcast %210 : vector<8x1xf32> to vector<8x8xf32>
      %214 = arith.mulf %212, %213 : vector<8x8xf32>
      %c0_148 = arith.constant 0 : index
      %c24 = arith.constant 24 : index
      %215 = vector.load %arg19[%c0_148, %c24] : memref<8x32xf32, #tpu.memory_space<vmem>>, vector<8x8xf32>
      tpu.vector_store %arg19[%c0_148, %c24], %214 {strides = array<i32>} : memref<8x32xf32, #tpu.memory_space<vmem>>, vector<8x8xf32>,
      %c0_149 = arith.constant 0 : index
      %c0_150 = arith.constant 0 : index
      %216 = vector.load %arg19[%c0_149, %c0_150] : memref<8x32xf32, #tpu.memory_space<vmem>>, vector<8x32xf32>
      %c0_151 = arith.constant 0 : index
      %c0_152 = arith.constant 0 : index
      %217 = vector.load %arg13[%c0_151, %c0_152] : memref<32x32xf32, #tpu.memory_space<vmem>>, vector<32x32xf32>
      %cst_153 = arith.constant dense<0.000000e+00> : vector<8x32xf32>
      %218 = tpu.matmul %216, %217, %cst_153 {dimension_numbers = #tpu.dot_dimension_numbers<[1], [0], [0], [1], [0, 0, 1, 1], [], []>} : vector<8x32xf32>, vector<32x32xf32>, vector<8x32xf32> -> vector<8x32xf32>
      %219 = vector.shape_cast %218 : vector<8x32xf32> to vector<1x8x32xf32>
      %c0_154 = arith.constant 0 : index
      %c0_155 = arith.constant 0 : index
      %c0_156 = arith.constant 0 : index
      %220 = vector.load %arg14[%c0_154, %c0_155, %c0_156] : memref<1x8x32xf32, #tpu.memory_space<vmem>>, vector<1x8x32xf32>
      tpu.vector_store %arg14[%c0_154, %c0_155, %c0_156], %219 {strides = array<i32>} : memref<1x8x32xf32, #tpu.memory_space<vmem>>, vector<1x8x32xf32>,
    } else {
    }
    return
  }
  func.func @transform_0(%arg0: i32, %arg1: i32, %arg2: i32) -> (i32, i32, i32) {
    %c0_i32 = arith.constant 0 : i32
    %c0_i32_0 = arith.constant 0 : i32
    return %arg0, %arg1, %c0_i32 : i32, i32, i32
  }
  func.func @transform_1(%arg0: i32, %arg1: i32, %arg2: i32) -> (i32, i32, i32) {
    %c0_i32 = arith.constant 0 : i32
    %c0_i32_0 = arith.constant 0 : i32
    %c0_i32_1 = arith.constant 0 : i32
    return %arg0, %c0_i32, %c0_i32_0 : i32, i32, i32
  }
  func.func @transform_2(%arg0: i32, %arg1: i32, %arg2: i32) -> (i32, i32, i32) {
    %c0_i32 = arith.constant 0 : i32
    %c0_i32_0 = arith.constant 0 : i32
    return %arg0, %arg2, %c0_i32 : i32, i32, i32
  }
  func.func @transform_3(%arg0: i32, %arg1: i32, %arg2: i32) -> (i32, i32) {
    %c0_i32 = arith.constant 0 : i32
    %c0_i32_0 = arith.constant 0 : i32
    %c0_i32_1 = arith.constant 0 : i32
    return %c0_i32, %c0_i32_0 : i32, i32
  }
  func.func @transform_4(%arg0: i32, %arg1: i32, %arg2: i32) -> (i32, i32) {
    %c0_i32 = arith.constant 0 : i32
    %c0_i32_0 = arith.constant 0 : i32
    %c0_i32_1 = arith.constant 0 : i32
    return %c0_i32, %c0_i32_0 : i32, i32
  }
  func.func @transform_5(%arg0: i32, %arg1: i32, %arg2: i32) -> (i32, i32) {
    %c0_i32 = arith.constant 0 : i32
    %c0_i32_0 = arith.constant 0 : i32
    %c0_i32_1 = arith.constant 0 : i32
    return %c0_i32, %c0_i32_0 : i32, i32
  }
  func.func @transform_6(%arg0: i32, %arg1: i32, %arg2: i32) -> (i32, i32) {
    %c0_i32 = arith.constant 0 : i32
    %c0_i32_0 = arith.constant 0 : i32
    %c0_i32_1 = arith.constant 0 : i32
    return %c0_i32, %c0_i32_0 : i32, i32
  }
  func.func @transform_7(%arg0: i32, %arg1: i32, %arg2: i32) -> (i32, i32) {
    %c0_i32 = arith.constant 0 : i32
    %c0_i32_0 = arith.constant 0 : i32
    %c0_i32_1 = arith.constant 0 : i32
    return %c0_i32, %c0_i32_0 : i32, i32
  }
  func.func @transform_8(%arg0: i32, %arg1: i32, %arg2: i32) -> (i32, i32) {
    %c0_i32 = arith.constant 0 : i32
    %c0_i32_0 = arith.constant 0 : i32
    %c0_i32_1 = arith.constant 0 : i32
    return %c0_i32, %c0_i32_0 : i32, i32
  }
  func.func @transform_9(%arg0: i32, %arg1: i32, %arg2: i32) -> (i32, i32) {
    %c0_i32 = arith.constant 0 : i32
    %c0_i32_0 = arith.constant 0 : i32
    %c0_i32_1 = arith.constant 0 : i32
    return %c0_i32, %c0_i32_0 : i32, i32
  }
  func.func @transform_10(%arg0: i32, %arg1: i32, %arg2: i32) -> (i32, i32) {
    %c0_i32 = arith.constant 0 : i32
    %c0_i32_0 = arith.constant 0 : i32
    %c0_i32_1 = arith.constant 0 : i32
    return %c0_i32, %c0_i32_0 : i32, i32
  }
  func.func @transform_11(%arg0: i32, %arg1: i32, %arg2: i32) -> (i32, i32, i32) {
    %c0_i32 = arith.constant 0 : i32
    %c0_i32_0 = arith.constant 0 : i32
    return %arg0, %arg1, %c0_i32 : i32, i32, i32
  }
}

</mosaic_0001>

<bundles_post_ra>
// kernel: tpu_custom_call.1
= control target key start
LH: loop header
LB: loop body
LE: loop exit
PB: predicated region body
PF: predicated region fallthrough
CT: control target
= control target key end

     0   :  { %s4770_s0 = inlined_call_operand.hbm [shape: f32[2,8,32], index: 0, kind: input, shape index: {}]   ;;  %s4771_s1 = inlined_call_operand.hbm [shape: f32[2,8,32], index: 1, kind: input, shape index: {}]   ;;  %s4772_s2 = inlined_call_operand.hbm [shape: f32[2,16,32], index: 2, kind: input, shape index: {}]   ;;  %s4773_s3 = inlined_call_operand.vmem [shape: f32[1,32], index: 3, kind: input, shape index: {}]   ;;  %s4774_s4 = inlined_call_operand.vmem [shape: f32[1,32], index: 4, kind: input, shape index: {}]   ;;  %s4775_s5 = inlined_call_operand.hbm [shape: f32[1,32], index: 5, kind: input, shape index: {}]   ;;  %s4776_s6 = inlined_call_operand.hbm [shape: f32[1,32], index: 6, kind: input, shape index: {}]   ;;  %s4777_s7 = inlined_call_operand.hbm [shape: f32[32,32], index: 7, kind: input, shape index: {}]   ;;  %s4778_s8 = inlined_call_operand.hbm [shape: f32[32,32], index: 8, kind: input, shape index: {}]   ;;  %s4779_s9 = inlined_call_operand.vmem [shape: f32[32,32], index: 9, kind: input, shape index: {}]   ;;  %s4780_s10 = inlined_call_operand.hbm [shape: f32[32,32], index: 10, kind: input, shape index: {}]   ;;  %s4781_s11 = inlined_call_operand.hbm [shape: f32[2,8,32], index: 11, kind: output, shape index: {}]  }
   0x1   :  { %4809 = sst [smem:[#allocation36_spill]] %s4771_s1 }
   0x2   :  { %4810 = sst [smem:[#allocation37_spill]] %s4774_s4 }
   0x3   :  { %4811 = sst [smem:[#allocation38_spill]] %s4775_s5 }
   0x4   :  { %4812 = sst [smem:[#allocation39_spill]] %s4776_s6 }
   0x5   :  { %4813 = sst [smem:[#allocation40_spill]] %s4777_s7 }
   0x6   :  { %4814 = sst [smem:[#allocation41_spill]] %s4781_s11 }
   0x7   :  { %16 = vsyncpa [#allocation8], 0 }
   0x8   :  { %18 = vsyncpa [#allocation8 + $0x1], 0 }
   0x9   :  { %19 = vsyncpa [#allocation11], 0 }
   0xa   :  { %21 = vsyncpa [#allocation11 + $0x1], 0 }
   0xb   :  { %22 = vsyncpa [#allocation14], 0 }
   0xc   :  { %23 = vsyncpa [#allocation17], 0 }
   0xd   :  { %24 = vsyncpa [#allocation20], 0 }
   0xe   :  { %25 = vsyncpa [#allocation9], 0 }
   0xf   :  { %27 = vsyncpa [#allocation9 + $0x1], 0  ;;  %s3954_s17 = smov 0   ;;  %s3956_s18 = smov 0  }
  0x10   :  { %s3958_s19 = smov 0   ;;  %s3960_s20 = smov 0  }
  0x11   :  { %s3962_s21 = smov 0   ;;  %s3964_s22 = smov 0  }
  0x12 LB: > { %4815 = sst [smem:[#allocation28_spill]] %s3850_s17  ;;  %s3985_s23 = sadd.s32 4294967295, %s3870_s22   ;;  %s3870_s22 = sphi %s3964_s22, %s33_s22   ;;  %s3866_s21 = sphi %s3962_s21, %s4871_s21   ;;  %s3862_s20 = sphi %s3960_s20, %s4870_s20   ;;  %s3858_s19 = sphi %s3958_s19, %s4866_s19   ;;  %s3854_s18 = sphi %s3956_s18, %s4869_s18   ;;  %s3850_s17 = sphi %s3954_s17, %s4868_s17  }
  0x13   : > { %4816 = sst [smem:[#allocation29_spill]] %s3858_s19  ;;  %p2958_p0 = scmp.ge.s32.totalorder %s3870_s22, 1 }
  0x14   : > { %4817 = sst [smem:[#allocation30_spill]] %s3862_s20  ;;  %p4782_p1 = scmp.eq.s32.totalorder %s3985_s23, 0 }
  0x15   : > { %4818 = sst [smem:[#allocation31_spill]] %s3870_s22  ;;  %p335_p2 = scmp.lt.s32.totalorder %s3870_s22, 3 }
  0x16   : > { %s3872_s25 = smov [#allocation13]   ;;  %s3873_s27 = smov [#allocation16]  }
  0x17   : > { %p3990_p3 = pnand %p2958_p0, %p335_p2  ;;  %s354_s26 = sshll.u32 %s3872_s25, 4  ;;  %s355_s26 = int_to_ptr.vmem [resolvable:$true] %s354_s26 }
  0x18   : > { %s375_s28 = sshll.u32 %s3873_s27, 4  ;;  %s4821_s5 = sld [smem:[#allocation38_spill]]  ;;  %s4003_s28 = int_to_ptr.vmem [resolvable:$true] %s375_s28 }
  0x19   : > { %s4819_s24 = scalar_select %p3990_p3, 1, 0 }
  0x1a   : > { %p3356_p5 = pneg %p3990_p3 }
  0x1c   : > { %p3999_p6 = pnand %p3356_p5, %p4782_p1 }
  0x1e   : > { %s4820_s29 = scalar_select %p3999_p6, 1, 0 }
  0x1f   : > { %s3542_s13 = scalar_lea.hbm %s4821_s5, 16  ;;  %p4013_p8 = pneg %p3999_p6 }
  0x20   : > { %p3543_p7 = scmp.ne.s32.totalorder %s4821_s5, %s3542_s13  ;;  %p3549_p11 = scmp.lt.u32.totalorder %s3542_s13, %s4821_s5 }
  0x21   : > { %s4822_s16 = scalar_select %p4013_p8, 1, 0 }
  0x22   : > { %p3545_p9 = pnand %p4013_p8, %p3543_p7 }
  0x24   : > { %p3546_p10 = pneg %p3545_p9 }
  0x26   : > { %p3551_p12 = pnand %p3549_p11, %p3546_p10 }
  0x28   : > { %3554 = shalt.err (!%p3551_p12)
}
  0x29   : > { %s3555_s30 = scalar_lea.vmem %s355_s26, 16  ;;  %s3562_s12 = scalar_lea.vmem %s355_s26, 32 }
  0x2a   : > { %p3556_p13 = scmp.ne.s32.totalorder %s355_s26, %s3555_s30  ;;  %p3563_p5 = scmp.lt.s32.totalorder %s355_s26, %s355_s26 }
  0x2b   : > { %p3564_p4 = scmp.lt.s32.totalorder %s3562_s12, %s3555_s30 }
  0x2c   : > { %p3558_p0 = pnand %p3556_p13, %p4013_p8 }
  0x2d   : > { %p3565_p1 = por %p3564_p4, %p3563_p5 }
  0x2e   : > { %p3559_p2 = pneg %p3558_p0 }
  0x30   : > { %p3566_p3 = pnand %p3565_p1, %p3559_p2 }
  0x32   : > { %3569 = shalt.err (!%p3566_p3)
}
  0x33   : > { %3359 = dma.hbm_to_vmem [thread:$0]  (!%p3999_p6), %s4821_s5, 16, %s355_s26, [#allocation14]  }
  0x34   : > { %s4823_s7 = sld [smem:[#allocation40_spill]] }
  0x3a   : > { %s3570_s27 = scalar_lea.hbm %s4823_s7, 512 }
  0x3b   : > { %p3571_p7 = scmp.ne.s32.totalorder %s4823_s7, %s3570_s27  ;;  %p3577_p1 = scmp.lt.u32.totalorder %s3570_s27, %s4823_s7 }
  0x3d   : > { %p3573_p9 = pnand %p3571_p7, %p4013_p8 }
  0x3f   : > { %p3574_p4 = pneg %p3573_p9 }
  0x41   : > { %p3579_p3 = pnand %p3577_p1, %p3574_p4 }
  0x43   : > { %3582 = shalt.err (!%p3579_p3)
}
  0x44   : > { %s3583_s26 = scalar_lea.vmem %s4003_s28, 512  ;;  %p3591_p13 = scmp.lt.s32.totalorder %s4003_s28, %s4003_s28 }
  0x45   : > { %p3584_p10 = scmp.ne.s32.totalorder %s4003_s28, %s3583_s26  ;;  %p3592_p0 = scmp.lt.s32.totalorder %s3583_s26, %s3583_s26 }
  0x47   : > { %p3586_p11 = pnand %p3584_p10, %p4013_p8  ;;  %p3593_p2 = por %p3592_p0, %p3591_p13 }
  0x49   : > { %p3587_p12 = pneg %p3586_p11 }
  0x4b   : > { %p3594_p5 = pnand %p3593_p2, %p3587_p12 }
  0x4d   : > { %3597 = shalt.err (!%p3594_p5)
}
  0x4e   : > { %s4785_s11 = smov 128   ;;  %s4787_s20 = smov 8  }
  0x4f   : > { %3365 = dma.hbm_to_vmem [thread:$0]  (!%p3999_p6), %s4823_s7, 512, %s4003_s28, [#allocation17], %s4785_s11, %s4785_s11, %s4787_s20  }
  0x50   : > { %s2957_s13 = sadd.s32 4294967294, %s3870_s22   ;;  %s52_s25 = sadd.s32 1, %s3866_s21 }
  0x51   : > { %p54_p7 = scmp.ge.s32.totalorder %s52_s25, 2  ;;  %s61_s27 = sadd.s32 1, %s3858_s19 }
  0x52   : > { %p68_p9 = scmp.ne.s32.totalorder %s3858_s19, %s3854_s18  ;;  %p69_p4 = scmp.eq.s32.totalorder %s3870_s22, 0 }
  0x53   : > { %s4873_s25 = smov (%p54_p7, %s52_s25), 0  ;;  %p74_p3 = scmp.ne.s32.totalorder %s3854_s18, %s3850_s17 }
  0x54   : > { %4824 = sst [smem:[#allocation32_spill]] %s4873_s25  ;;  %p4063_p1 = por %p69_p4, %p68_p9 }
  0x55   : > { %s56_s28 = ssub.s32 %s3866_s21, %s4873_s25  ;;  %p322_p10 = scmp.eq.s32.totalorder %s3985_s23, 1 }
  0x56   : > { %p59_p11 = scmp.eq.s32.totalorder %s56_s28, 0  ;;  %p4826_p12 = scmp.eq.s32.totalorder %s3985_s23, 0 }
  0x57   : > { %p4078_p0 = por %p322_p10, %p68_p9  ;;  %p328_p2 = scmp.eq.s32.totalorder %s2957_s13, 1 }
  0x58   : > { %p4074_p13 = por %p4826_p12, %p74_p3  ;;  %p3391_p7 = scmp.lt.s32.totalorder %s3870_s22, 2 }
  0x59   : > { %s4828_s26 = scalar_select %p4078_p0, 1, 0 }
  0x5a   : > { %s4827_s12 = scalar_select %p4074_p13, 1, 0 }
  0x5b   : > { %4829 = sst [smem:[#allocation33_spill]] %s4828_s26  ;;  %p4085_p5 = por %p328_p2, %p74_p3 }
  0x5c   : > { %s4083_s14 = scalar_select %p59_p11, %s3858_s19, %s61_s27  }
  0x5d   : > { %s4831_s15 = scalar_select %p4085_p5, 1, 0 }
  0x5e   : > { %4830 = sst [smem:[#allocation34_spill]] %s4083_s14  ;;  %s4091_s11 = sand.u32 1, %s3858_s19  }
  0x5f   : > { %4832 = sst [smem:[#allocation35_spill]] %s4831_s15  ;;  %s4796_s28 = sshll.u32 %s3866_s21, 7 }
  0x60   : > { %s4795_s20 = sshll.u32 %s4091_s11, 3  ;;  %p4097_p9 = pnand %p3391_p7, %p4063_p1 }
  0x61   : > { %s437_s13 = sand.u32 1, %s3870_s22   ;;  %s4834_s1 = sld [smem:[#allocation36_spill]] }
  0x62   : > { %s4833_s5 = scalar_select %p4097_p9, 1, 0 }
  0x63   : > { %s441_s14 = scalar_lea.vmem [#allocation10], %s4795_s20  ;;  %s2969_s30 = sshll.u32 %s4091_s11, 4 }
  0x64   : > { %s448_s19 = sshll.u32 %s441_s14, 4  ;;  %s4114_s15 = scalar_lea.sflag [#allocation11], %s437_s13  ;;  %s4111_s19 = int_to_ptr.vmem [resolvable:$true] %s448_s19 }
  0x65   : > { %p4120_p1 = pneg %p4097_p9 }
  0x67   : > { %s4107_s25 = scalar_lea.hbm %s4834_s1, %s4796_s28  ;;  %s3603_s14 = scalar_lea.hbm %s4834_s1, 256 }
  0x68   : > { %s3598_s17 = scalar_lea.hbm %s4107_s25, 128  ;;  %p3604_p11 = scmp.lt.u32.totalorder %s4107_s25, %s4834_s1 }
  0x69   : > { %p3599_p4 = scmp.ne.s32.totalorder %s4107_s25, %s3598_s17  ;;  %p3605_p12 = scmp.lt.u32.totalorder %s3603_s14, %s3598_s17 }
  0x6a   : > { %s4835_s22 = scalar_select %p4120_p1, 1, 0 }
  0x6b   : > { %p3601_p3 = pnand %p4120_p1, %p3599_p4  ;;  %p3606_p2 = por %p3605_p12, %p3604_p11 }
  0x6c   : > { %p3607_p7 = scmp.lt.u32.totalorder %s3598_s17, %s4107_s25 }
  0x6d   : > { %p3602_p10 = pneg %p3601_p3 }
  0x6e   : > { %p3608_p5 = por %p3607_p7, %p3606_p2 }
  0x70   : > { %p3609_p0 = pnand %p3608_p5, %p3602_p10 }
  0x72   : > { %3612 = shalt.err (!%p3609_p0)
}
  0x73   : > { %s3613_s13 = scalar_lea.vmem %s4111_s19, 128  ;;  %s3876_s7 = smov [#allocation10]  }
  0x74   : > { %p3614_p4 = scmp.ne.s32.totalorder %s4111_s19, %s3613_s13  ;;  %s3618_s27 = sshll.u32 %s3876_s7, 4  ;;  %s3619_s27 = int_to_ptr.vmem [resolvable:$false] %s3618_s27 }
  0x75   : > { %s3620_s20 = scalar_lea.vmem %s3619_s27, 256  ;;  %p3621_p6 = scmp.lt.s32.totalorder %s4111_s19, %s3619_s27 }
  0x76   : > { %p3616_p3 = pnand %p3614_p4, %p4120_p1  ;;  %p3622_p8 = scmp.lt.s32.totalorder %s3620_s20, %s3613_s13 }
  0x78   : > { %p3617_p13 = pneg %p3616_p3  ;;  %p3623_p11 = por %p3622_p8, %p3621_p6 }
  0x7a   : > { %p3624_p12 = pnand %p3623_p11, %p3617_p13 }
  0x7c   : > { %3627 = shalt.err (!%p3624_p12)
}
  0x7d   : > { %3378 = dma.hbm_to_vmem [thread:$0]  (!%p4097_p9), %s4107_s25, 128, %s4111_s19, %s4114_s15  }
  0x7e   : > { %s459_s17 = scalar_lea.vmem [#allocation12], %s2969_s30  ;;  %s3877_s14 = smov [#allocation15]  }
  0x7f   : > { %s468_s28 = sshll.u32 %s459_s17, 4  ;;  %s365_s7 = sshll.u32 %s3877_s14, 4  ;;  %s4146_s28 = int_to_ptr.vmem [resolvable:$true] %s468_s28  ;;  %s366_s7 = int_to_ptr.vmem [resolvable:$true] %s365_s7 }
  0x80   : > { %s4836_s6 = sld [smem:[#allocation39_spill]]  ;;  %p4837_p8 = scmp.ne.s32.totalorder %s4822_s16, 0 }
  0x86   : > { %s3628_s20 = scalar_lea.hbm %s4836_s6, 16 }
  0x87   : > { %p3629_p6 = scmp.ne.s32.totalorder %s4836_s6, %s3628_s20  ;;  %p3635_p5 = scmp.lt.u32.totalorder %s3628_s20, %s4836_s6 }
  0x89   : > { %p3631_p13 = pnand %p3629_p6, %p4837_p8 }
  0x8b   : > { %p3632_p0 = pneg %p3631_p13 }
  0x8d   : > { %p3637_p10 = pnand %p3635_p5, %p3632_p0 }
  0x8f   : > { %3640 = shalt.err (!%p3637_p10)
}
  0x90   : > { %s3641_s30 = scalar_lea.vmem %s366_s7, 16  ;;  %s3648_s17 = scalar_lea.vmem %s366_s7, 32 }
  0x91   : > { %p3642_p2 = scmp.ne.s32.totalorder %s366_s7, %s3641_s30  ;;  %p3649_p3 = scmp.lt.s32.totalorder %s366_s7, %s366_s7 }
  0x92   : > { %p3650_p11 = scmp.lt.s32.totalorder %s3648_s17, %s3641_s30 }
  0x93   : > { %p3644_p7 = pnand %p3642_p2, %p4837_p8 }
  0x94   : > { %p3651_p12 = por %p3650_p11, %p3649_p3 }
  0x95   : > { %p3645_p4 = pneg %p3644_p7 }
  0x97   : > { %p3652_p9 = pnand %p3651_p12, %p3645_p4 }
  0x99   : > { %3655 = shalt.err (!%p3652_p9)
}
  0x9a   : > { %p4838_p6 = scmp.ne.s32.totalorder %s4820_s29, 0  ;;  %s3878_s14 = smov [#allocation18]  }
  0x9b   : > { %s388_s13 = sshll.u32 %s3878_s14, 4  ;;  %s3879_s27 = smov [#allocation19]   ;;  %s389_s13 = int_to_ptr.vmem [resolvable:$true] %s388_s13 }
  0x9c   : > { %3362 = dma.hbm_to_vmem [thread:$0]  (!%p4838_p6), %s4836_s6, 16, %s366_s7, [#allocation14]  }
  0x9d   : > { %s404_s20 = sshll.u32 %s3879_s27, 4  ;;  %s3656_s30 = scalar_lea.hbm %s4778_s8, 512  ;;  %s4166_s20 = int_to_ptr.vmem [resolvable:$true] %s404_s20 }
  0x9e   : > { %p3657_p9 = scmp.ne.s32.totalorder %s4778_s8, %s3656_s30  ;;  %p3663_p5 = scmp.lt.u32.totalorder %s3656_s30, %s4778_s8 }
  0xa0   : > { %p3659_p13 = pnand %p3657_p9, %p4837_p8 }
  0xa2   : > { %p3660_p0 = pneg %p3659_p13 }
  0xa4   : > { %p3665_p10 = pnand %p3663_p5, %p3660_p0 }
  0xa6   : > { %3668 = shalt.err (!%p3665_p10)
}
  0xa7   : > { %s3669_s26 = scalar_lea.vmem %s389_s13, 512  ;;  %p3677_p3 = scmp.lt.s32.totalorder %s389_s13, %s389_s13 }
  0xa8   : > { %p3670_p2 = scmp.ne.s32.totalorder %s389_s13, %s3669_s26  ;;  %p3678_p11 = scmp.lt.s32.totalorder %s3669_s26, %s3669_s26 }
  0xaa   : > { %p3672_p7 = pnand %p3670_p2, %p4837_p8  ;;  %p3679_p12 = por %p3678_p11, %p3677_p3 }
  0xac   : > { %p3673_p4 = pneg %p3672_p7 }
  0xae   : > { %p3680_p1 = pnand %p3679_p12, %p3673_p4 }
  0xb0   : > { %3683 = shalt.err (!%p3680_p1)
}
  0xb1   : > { %s4839_s4 = smov 8   ;;  %s4840_s14 = smov 128  }
  0xb2   : > { %3368 = dma.hbm_to_vmem [thread:$0]  (!%p4838_p6), %s4778_s8, 512, %s389_s13, [#allocation17], %s4840_s14, %s4840_s14, %s4839_s4  }
  0xb3   : > { %s3684_s17 = scalar_lea.hbm %s4780_s10, 512 }
  0xb4   : > { %p3685_p9 = scmp.ne.s32.totalorder %s4780_s10, %s3684_s17  ;;  %p3691_p0 = scmp.lt.u32.totalorder %s3684_s17, %s4780_s10 }
  0xb6   : > { %p3687_p1 = pnand %p3685_p9, %p4837_p8 }
  0xb8   : > { %p3688_p13 = pneg %p3687_p1 }
  0xba   : > { %p3693_p5 = pnand %p3691_p0, %p3688_p13 }
  0xbc   : > { %3696 = shalt.err (!%p3693_p5)
}
  0xbd   : > { %s3697_s13 = scalar_lea.vmem %s4166_s20, 512  ;;  %p3705_p4 = scmp.lt.s32.totalorder %s4166_s20, %s4166_s20 }
  0xbe   : > { %p3698_p10 = scmp.ne.s32.totalorder %s4166_s20, %s3697_s13  ;;  %p3706_p3 = scmp.lt.s32.totalorder %s3697_s13, %s3697_s13 }
  0xc0   : > { %p3700_p2 = pnand %p3698_p10, %p4837_p8  ;;  %p3707_p11 = por %p3706_p3, %p3705_p4 }
  0xc2   : > { %p3701_p7 = pneg %p3700_p2 }
  0xc4   : > { %p3708_p12 = pnand %p3707_p11, %p3701_p7 }
  0xc6   : > { %3711 = shalt.err (!%p3708_p12)
}
  0xc7   : > { %3371 = dma.hbm_to_vmem [thread:$0]  (!%p4838_p6), %s4780_s10, 512, %s4166_s20, [#allocation20], %s4840_s14, %s4840_s14, %s4839_s4  }
  0xc8   : > { %s4841_s16 = sshll.u32 %s3866_s21, 7  ;;  %s4842_s29 = sshll.u32 %s4091_s11, 3 }
  0xc9   : > { %s4220_s30 = scalar_lea.hbm %s4770_s0, %s4841_s16  ;;  %s422_s17 = scalar_lea.vmem [#allocation7], %s4842_s29 }
  0xca   : > { %s430_s1 = sshll.u32 %s422_s17, 4  ;;  %s3025_s7 = sshll.u32 %s3866_s21, 8  ;;  %s4224_s1 = int_to_ptr.vmem [resolvable:$true] %s430_s1 }
  0xcb   : > { %s419_s26 = scalar_lea.sflag [#allocation8], %s4091_s11  ;;  %s3712_s13 = scalar_lea.hbm %s4220_s30, 128 }
  0xcc   : > { %p3713_p8 = scmp.ne.s32.totalorder %s4220_s30, %s3712_s13  ;;  %p4843_p6 = scmp.ne.s32.totalorder %s4835_s22, 0 }
  0xcd   : > { %s3717_s27 = scalar_lea.hbm %s4770_s0, 256  ;;  %p3718_p13 = scmp.lt.u32.totalorder %s4220_s30, %s4770_s0 }
  0xce   : > { %p3715_p9 = pnand %p3713_p8, %p4843_p6  ;;  %p3719_p0 = scmp.lt.u32.totalorder %s3717_s27, %s3712_s13 }
  0xcf   : > { %p3721_p10 = scmp.lt.u32.totalorder %s3712_s13, %s4220_s30 }
  0xd0   : > { %p3716_p1 = pneg %p3715_p9  ;;  %p3720_p5 = por %p3719_p0, %p3718_p13 }
  0xd2   : > { %p3722_p2 = por %p3721_p10, %p3720_p5 }
  0xd4   : > { %p3723_p7 = pnand %p3722_p2, %p3716_p1 }
  0xd6   : > { %3726 = shalt.err (!%p3723_p7)
}
  0xd7   : > { %s3727_s11 = scalar_lea.vmem %s4224_s1, 128  ;;  %s3880_s25 = smov [#allocation7]  }
  0xd8   : > { %p3728_p4 = scmp.ne.s32.totalorder %s4224_s1, %s3727_s11  ;;  %s3732_s29 = sshll.u32 %s3880_s25, 4  ;;  %s3733_s29 = int_to_ptr.vmem [resolvable:$false] %s3732_s29 }
  0xd9   : > { %s3734_s17 = scalar_lea.vmem %s3733_s29, 256  ;;  %p3735_p12 = scmp.lt.s32.totalorder %s4224_s1, %s3733_s29 }
  0xda   : > { %p3730_p3 = pnand %p3728_p4, %p4843_p6  ;;  %p3736_p8 = scmp.lt.s32.totalorder %s3734_s17, %s3727_s11 }
  0xdc   : > { %p3731_p11 = pneg %p3730_p3  ;;  %p3737_p9 = por %p3736_p8, %p3735_p12 }
  0xde   : > { %p3738_p13 = pnand %p3737_p9, %p3731_p11 }
  0xe0   : > { %3741 = shalt.err (!%p3738_p13)
}
  0xe1   : > { %p4844_p1 = scmp.ne.s32.totalorder %s4833_s5, 0  ;;  %s4254_s6 = scalar_lea.hbm %s4772_s2, %s3025_s7 }
  0xe2   : > { %s3742_s27 = scalar_lea.hbm %s4254_s6, 256  ;;  %s3747_s11 = scalar_lea.hbm %s4772_s2, 512 }
  0xe3   : > { %3375 = dma.hbm_to_vmem [thread:$0]  (!%p4844_p1), %s4220_s30, 128, %s4224_s1, %s419_s26  }
  0xe4   : > { %p3743_p0 = scmp.ne.s32.totalorder %s4254_s6, %s3742_s27  ;;  %p3748_p2 = scmp.lt.u32.totalorder %s4254_s6, %s4772_s2 }
  0xe5   : > { %p3749_p7 = scmp.lt.u32.totalorder %s3747_s11, %s3742_s27  ;;  %p3751_p3 = scmp.lt.u32.totalorder %s3742_s27, %s4254_s6 }
  0xe6   : > { %p3745_p5 = pnand %p3743_p0, %p4843_p6 }
  0xe7   : > { %p3750_p4 = por %p3749_p7, %p3748_p2 }
  0xe8   : > { %p3746_p10 = pneg %p3745_p5 }
  0xe9   : > { %p3752_p11 = por %p3751_p3, %p3750_p4 }
  0xeb   : > { %p3753_p12 = pnand %p3752_p11, %p3746_p10 }
  0xed   : > { %3756 = shalt.err (!%p3753_p12)
}
  0xee   : > { %s3757_s7 = scalar_lea.vmem %s4146_s28, 256  ;;  %s3881_s26 = smov [#allocation12]  }
  0xef   : > { %p3758_p8 = scmp.ne.s32.totalorder %s4146_s28, %s3757_s7  ;;  %s3762_s25 = sshll.u32 %s3881_s26, 4  ;;  %s3763_s25 = int_to_ptr.vmem [resolvable:$false] %s3762_s25 }
  0xf0   : > { %s3764_s29 = scalar_lea.vmem %s3763_s25, 512  ;;  %p3765_p0 = scmp.lt.s32.totalorder %s4146_s28, %s3763_s25 }
  0xf1   : > { %p3760_p9 = pnand %p3758_p8, %p4843_p6  ;;  %p3766_p5 = scmp.lt.s32.totalorder %s3764_s29, %s3757_s7 }
  0xf3   : > { %p3761_p13 = pneg %p3760_p9  ;;  %p3767_p2 = por %p3766_p5, %p3765_p0 }
  0xf5   : > { %p3768_p7 = pnand %p3767_p2, %p3761_p13 }
  0xf7   : > { %3771 = shalt.err (!%p3768_p7)
}
  0xf8   : > { %3381 = dma.hbm_to_vmem [thread:$0]  (!%p4844_p1), %s4254_s6, 256, %s4146_s28, %s4114_s15, %s4840_s14, %s4840_s14, %s4839_s4  }
  0xf9   : > { %p4845_p6 = scmp.ne.s32.totalorder %s4819_s24, 0 }
  0xfa   : > { %s4284_s22 = sand.u32 (!%p4845_p6), 1, %s3854_s18   ;;  %p4846_p10 = scmp.ne.s32.totalorder (!%p4845_p6), %s4827_s12, 0 }
  0xfb   : > { %480 = sbr.rel (%p4845_p6) target bundleno = 4074 (0xfea), region = 64  ;;  %s483_s17 = scalar_lea.sflag (!%p4845_p6), [#allocation8], %s4284_s22 }
 0x102   : > { %3825 = dma.done.wait (%p4846_p10), %s483_s17, 128  }
 0x103   : > { %3827 = vsyncadd (%p4846_p10), %s483_s17, 4294967168  ;;  %s491_s5 = sand.u32 1, %s3985_s23   ;;  %s2973_s15 = sshll.u32 %s4284_s22, 3 }
 0x104   : > { %s492_s28 = scalar_lea.sflag [#allocation11], %s491_s5  ;;  %s495_s24 = scalar_lea.vmem [#allocation10], %s2973_s15 }
 0x105   : > { %3829 = dma.done.wait (%p4846_p10), %s492_s28, 384  }
 0x106   : > { %3831 = vsyncadd (%p4846_p10), %s492_s28, 4294966912  ;;  %s2974_s4 = sshll.u32 %s4284_s22, 4  ;;  %p4847_p1 = scmp.eq.s32.totalorder %s3985_s23, 0 }
 0x107   : > { %s4300_s14 = scalar_lea.vmem [#allocation12], %s2974_s4 }
 0x108   : > { %3833 = dma.done.wait (%p4847_p1), [#allocation14], 32   ;;  %p4848_p4 = pmov %p4847_p1 }
 0x109   : > { %p4849_p3 = pmov %p4847_p1 }
 0x10a   : > { %3835 = vsyncadd (%p4848_p4), [#allocation14], 4294967264 }
 0x10b   : > { %3837 = dma.done.wait (%p4849_p3), [#allocation17], 1024   ;;  %p4850_p11 = pmov %p4847_p1 }
 0x10c   : > { %p4851_p12 = pmov %p4847_p1 }
 0x10d   : > { %3839 = vsyncadd (%p4850_p11), [#allocation17], 4294966272 }
 0x10e   : > { %3841 = dma.done.wait (%p4851_p12), [#allocation20], 512   ;;  %p4852_p8 = pmov %p4847_p1 }
 0x10f   : > { %vm595_vm0 = vcmask 261120   ;;  %v594_v0 = vld [vmem:[%s495_s24] sm:$0xff]  ;;  %v626_v4 = vld [vmem:[#allocation16] sm:$0xff]  ;;  %v3882_v7 = vmov 0.0|0.0   ;;  %vm3883_vm1 = vmmov 0   ;;  %v3884_v15 = vmov 0.0  }
 0x110   : > { %3843 = vsyncadd (%p4852_p8), [#allocation20], 4294966784  ;;  %v596_v1 = vsel %vm595_vm0, %v594_v0, 0.0  ;;  %v601_v2 = vmul.f32 %v594_v0, %v594_v0  ;;  %v627_v5 = vld [vmem:[#allocation16 + $0x8] sm:$0xff]  ;;  %v720_v6 = vld [vmem:[#allocation18] sm:$0xff]  ;;  %3260 = vmatprep.subr.bf16.mxu0 %v3882_v7  ;;  %3266 = vmatprep.subr.bf16.mxu1 %v3882_v7  ;;  %vm587_vm2 = vcmask 64512  }
 0x111   : > { %597 = vadd.xlane.f32.xlu0 %v596_v1  ;;  %v3261_v8 = vpack.c.bf16 %v627_v5, %v626_v4  ;;  %v721_v9 = vld [vmem:[#allocation18 + $0x8] sm:$0xff]  ;;  %v628_v10 = vld [vmem:[#allocation16 + $0x10] sm:$0xff]  ;;  %v629_v11 = vld [vmem:[#allocation16 + $0x18] sm:$0xff]  ;;  %3106 = vmatprep.mubr.msk.f32.mxu0 %vm3883_vm1, %v3884_v15  ;;  %588 = vst.msk [vmem:[#allocation5] sm:$0xff] %vm587_vm2, %v3884_v15  ;;  %s3885_s11 = smov 112   ;;  %vm578_vm3 = vcmask 7168  }
 0x112   : > { %v602_v3 = vsel %vm595_vm0, %v601_v2, 0.0  ;;  %v4318_v12 = vpack.c.bf16 %v721_v9, %v720_v6  ;;  %v722_v13 = vld [vmem:[#allocation18 + $0x10] sm:$0xff]  ;;  %v723_v14 = vld [vmem:[#allocation18 + $0x18] sm:$0xff]  ;;  %3117 = vmatprep.mubr.msk.f32.mxu1 %vm3883_vm1, %v3884_v15  ;;  %v3264_v16 = vpack.c.bf16 %v629_v11, %v628_v10  ;;  %589 = vst.msk [vmem:[#allocation5 + $0x8] sm:$0xff] %vm587_vm2, %v3884_v15  ;;  %590 = vst.msk [vmem:[#allocation5 + $0x10] sm:$0xff] %vm587_vm2, %v3884_v15  ;;  %v3886_v60 = vmov -inf  }
 0x113   : > { %3262 = vmatpush3.bf16.msra.mxu0 %v3261_v8  ;;  %v4326_v17 = vpack.c.bf16 %v723_v14, %v722_v13  ;;  %v4333_v18 = vld [vmem:[%s4300_s14] sm:$0xff]  ;;  %v4336_v19 = vld [vmem:[%s4300_s14 + $0x8] sm:$0xff]  ;;  %591 = vst.msk [vmem:[#allocation5 + $0x18] sm:$0xff] %vm587_vm2, %v3884_v15  ;;  %v3887_v2 = vmov 0   ;;  %s3888_s30 = smov 120   ;;  %s3889_s1 = smov 104   ;;  %vm4487_vm4 = vmpackc.low %vm587_vm2, %vm587_vm2 }
 0x114   : > { %3268 = vmatpush3.bf16.msra.mxu1 %v4318_v12  ;;  %3263 = vmatprep.subr.bf16.mxu0 %v3882_v7  ;;  %v1627_v20 = vsel %vm595_vm0, %v4333_v18, 0.0  ;;  %v1630_v21 = vsel %vm595_vm0, %v4336_v19, 0.0  ;;  %v1636_v22 = vmul.f32 %v4333_v18, %v4333_v18  ;;  %v1637_v24 = vmul.f32 %v4336_v19, %v4336_v19  ;;  %v2981_v35 = vld [vmem:[#allocation13] ss:$0 sm:$0xff]  ;;  %v794_v37 = vld [vmem:[%s4779_s9] sm:$0xff]  ;;  %v796_v43 = vld [vmem:[%s4779_s9 + $0x10] sm:$0xff] }
 0x115   : > { %603 = vadd.xlane.f32.xlu0 %v602_v3  ;;  %3269 = vmatprep.subr.bf16.mxu1 %v3882_v7  ;;  %v795_v38 = vld [vmem:[%s4779_s9 + $0x8] sm:$0xff]  ;;  %v797_v44 = vld [vmem:[%s4779_s9 + $0x18] sm:$0xff]  ;;  %579 = vst.msk [vmem:[#allocation3] sm:$0xff] %vm578_vm3, %v3886_v60  ;;  %580 = vst.msk [vmem:[#allocation3 + $0x8] sm:$0xff] %vm578_vm3, %v3886_v60  ;;  %s4853_s17 = sld [smem:[#allocation37_spill]]  ;;  %vm1920_vm5 = vcmask 130048  }
 0x116   : > { %v1638_v23 = vsel %vm595_vm0, %v1636_v22, 0.0  ;;  %v1641_v25 = vsel %vm595_vm0, %v1637_v24, 0.0  ;;  %v2982_v39 = vld [vmem:[#allocation15] ss:$0 sm:$0xff]  ;;  %v4362_v41 = vpack.c.bf16 %v795_v38, %v794_v37  ;;  %v4373_v45 = vpack.c.bf16 %v797_v44, %v796_v43  ;;  %581 = vst.msk [vmem:[#allocation3 + $0x10] sm:$0xff] %vm578_vm3, %v3886_v60  ;;  %582 = vst.msk [vmem:[#allocation3 + $0x18] sm:$0xff] %vm578_vm3, %v3886_v60  ;;  %3464 = vset.pattern.permute.xlu1 %v3887_v2 }
 0x117   : > { %3265 = vmatpush3.bf16.msra.mxu0 %v3264_v16  ;;  %583 = vst.msk [vmem:[#allocation4] sm:$0xff] %vm578_vm3, %v3884_v15  ;;  %584 = vst.msk [vmem:[#allocation4 + $0x8] sm:$0xff] %vm578_vm3, %v3884_v15  ;;  %3465 = vset.pattern.permute.xlu0 %v3887_v2  ;;  %s3890_s5 = smov 16   ;;  %s3891_s28 = smov 8   ;;  %vm2651_vm6 = vcmask 130112   ;;  %vm2667_vm7 = vcmask 195712  }
 0x118   : > { %3271 = vmatpush3.bf16.msra.mxu1 %v4326_v17  ;;  %3272 = vmatprep.subr.bf16.mxu0 %v3882_v7  ;;  %585 = vst.msk [vmem:[#allocation4 + $0x10] sm:$0xff] %vm578_vm3, %v3884_v15  ;;  %586 = vst.msk [vmem:[#allocation4 + $0x18] sm:$0xff] %vm578_vm3, %v3884_v15  ;;  %s3892_s24 = smov 24   ;;  %s4856_s4 = sld [smem:[#allocation30_spill]]  ;;  %vm2683_vm8 = vcmask 261312  }
 0x119   : > { %3131 = vmatprep.subr.mxu1 %v3884_v15  ;;  %1628 = vadd.xlane.f32.xlu0 %v1627_v20  ;;  %s4857_s14 = sld [smem:[#allocation33_spill]]  ;;  %s572_s12 = scalar_lea.vmem [#allocation21], %s2973_s15 }
 0x11a   : > { %s2779_s13 = sshll.u32 %s572_s12, 4  ;;  %s4858_s27 = sld [smem:[#allocation41_spill]]  ;;  %s4722_s13 = int_to_ptr.vmem [resolvable:$true] %s2779_s13 }
 0x11b   : > { %s2765_s19 = scalar_lea.sflag [#allocation9], %s4284_s22  ;;  %s3893_s15 = smov [#allocation21]  }
 0x11c   : > { %v4413_v4 = vld [vmem:[#allocation3] sm:$0xff]  ;;  %v4502_v60 = vld [vmem:[#allocation3 + $0x8] sm:$0xff] }
 0x11d   : > { %1631 = vadd.xlane.f32.xlu0 %v1630_v21 }
 0x11e   : > { %s3022_s23 = sshll.u32 %s4856_s4, 7 }
 0x11f   : > { %p4859_p13 = scmp.ne.s32.totalorder %s4857_s14, 0 }
 0x120   : > { %s4720_s16 = scalar_lea.hbm %s4858_s27, %s3022_s23 }
 0x121   : > { %1639 = vadd.xlane.f32.xlu0 %v1638_v23 }
 0x125   : > { %1642 = vadd.xlane.f32.xlu0 %v1641_v25 }
 0x19e   : > { %v598_v26 = vpop.xlane.xlu0 %597 }
 0x19f   : > { %v600_v27 = vmul.f32 0.03125, %v598_v26 }
 0x1a1   : > { %v606_v29 = vmul.f32 %v600_v27, %v600_v27  ;;  %v608_v33 = vsub.f32 %v594_v0, %v600_v27 }
 0x1a2   : > { %v604_v28 = vpop.xlane.xlu0 %603 }
 0x1a3   : > { %v605_v30 = vmul.f32 0.03125, %v604_v28 }
 0x1a5   : > { %v607_v31 = vsub.f32 %v605_v30, %v606_v29  ;;  %v2998_v29 = vld [vmem:[%s4773_s3] ss:$0 sm:$0xff] }
 0x1a6   : > { %v1629_v46 = vpop.xlane.xlu0 %1628 }
 0x1a7   : > { %v609_v32 = vadd.f32 1e-05, %v607_v31  ;;  %v1634_v47 = vmul.f32 0.03125, %v1629_v46 }
 0x1a9   : > { %3496 = vrsqrt.f32 %v609_v32  ;;  %v1646_v49 = vmul.f32 %v1634_v47, %v1634_v47  ;;  %v1650_v8 = vsub.f32 %v4333_v18, %v1634_v47 }
 0x1aa   : > { %v1632_v48 = vpop.xlane.xlu0 %1631 }
 0x1ab   : > { %v1635_v13 = vmul.f32 0.03125, %v1632_v48 }
 0x1ad   : > { %v1647_v14 = vmul.f32 %v1635_v13, %v1635_v13  ;;  %v1651_v30 = vsub.f32 %v4336_v19, %v1635_v13 }
 0x1ae   : > { %v1640_v50 = vpop.xlane.xlu0 %1639 }
 0x1af   : > { %v1644_v51 = vmul.f32 0.03125, %v1640_v50 }
 0x1b1   : > { %v1648_v52 = vsub.f32 %v1644_v51, %v1646_v49 }
 0x1b2   : > { %v1643_v61 = vpop.xlane.xlu0 %1642 }
 0x1b3   : > { %v3497_v34 = vpop.eup %3496  ;;  %v1652_v3 = vadd.f32 1e-05, %v1648_v52  ;;  %v1645_v16 = vmul.f32 0.03125, %v1643_v61 }
 0x1b4   : > { %v611_v36 = vmul.f32 %v3497_v34, %v608_v33 }
 0x1b5   : > { %3498 = vrsqrt.f32 %v1652_v3  ;;  %v1649_v20 = vsub.f32 %v1645_v16, %v1647_v14 }
 0x1b6   : > { %v618_v40 = vmul.f32 %v2981_v35, %v611_v36  ;;  %v2999_v35 = vld [vmem:[%s4853_s17] ss:$0 sm:$0xff] }
 0x1b7   : > { %v1653_v24 = vadd.f32 1e-05, %v1649_v20 }
 0x1b8   : > { %v625_v42 = vadd.f32 %v2982_v39, %v618_v40 }
 0x1ba   : > { %3107 = vmatmul.mubr.msk.f32.vlgmr.msra.gmra.mrb[0].mxu0 %vm595_vm0, %v625_v42  ;;  %3118 = vmatmul.mubr.msk.f32.vlgmr.msra.gmra.mrb[0].mxu1 %vm595_vm0, %v625_v42 }
 0x1bb   : > { %3274 = vmatpush3.bf16.msra.mxu0 %v4362_v41  ;;  %3128 = vmatprep.mubr.msk.f32.mxu0 %vm3883_vm1, %v3884_v15 }
 0x1bc   : > { %3275 = vmatprep.subr.bf16.mxu0 %v3882_v7  ;;  %3133 = vmatprep.mubr.msk.f32.mxu1 %vm3883_vm1, %v3884_v15 }
 0x1bf   : > { %3277 = vmatpush3.bf16.msra.mxu0 %v4373_v45  ;;  %v3499_v10 = vpop.eup %3498 }
 0x1c0   : > { %3151 = vmatprep.subr.mxu0 %v3884_v15  ;;  %v1656_v11 = vmul.f32 %v3499_v10, %v1650_v8 }
 0x1c2   : > { %3129 = vmatmul.mubr.msk.f32.vlgmr.msra.gmra.mrb[2].mxu0 %vm595_vm0, %v625_v42  ;;  %v1664_v34 = vmul.f32 %v2998_v29, %v1656_v11 }
 0x1c3   : > { %3153 = vmatprep.mubr.msk.f32.mxu0 %vm3883_vm1, %v3884_v15 }
 0x1c4   : > { %v4464_v38 = vadd.f32 %v2999_v35, %v1664_v34 }
 0x28d   : > { %v699_v53 = vpop.f32.mrb[0].mxu0  ;;  %v790_v54 = vpop.f32.mrb[0].mxu1 }
 0x28e   : > { %703 = vst.msk [vmem:[#allocation2] sm:$0xff] %vm587_vm2, %v699_v53  ;;  %v3119_v55 = vpop.f32.mrb[1].mxu1  ;;  %3132 = vmatpush3.xpose.msk.msra.mxu1 %vm587_vm2, %v790_v54  ;;  %710 = vrot.lane.b32.xlu0 %v699_v53, %s3885_s11  ;;  %v3108_v56 = vpop.f32.mrb[1].mxu0 }
 0x28f   : > { %3136 = vmatprep.subr.mxu1 %v3884_v15 }
 0x295   : > { %v4389_v57 = vpop.f32.mrb[2].mxu0  ;;  %v4391_v58 = vld [vmem:[#allocation2] sm:$0xff] }
 0x296   : > { %v3130_v59 = vpop.f32.mrb[3].mxu0  ;;  %3134 = vmatmul.mubr.msk.f32.vlgmr.msra.gmra.mrb[2].mxu1 %vm587_vm2, %v4391_v58 }
 0x297   : > { %3137 = vmatpush3.msra.mxu1 %v4389_v57  ;;  %3138 = vmatprep.mubr.msk.f32.mxu1 %vm3883_vm1, %v3884_v15  ;;  %v4500_v59 = vld [vmem:[#allocation3 + $0x10] sm:$0xff] }
 0x298   : > { %3141 = vmatprep.subr.mxu1 %v3884_v15 }
 0x300   : > { %v711_v62 = vpop.permute.xlu0 %710 }
 0x301   : > { %714 = vst.msk [vmem:[#allocation2 + $0x10] sm:$0xff] %vm587_vm2, %v711_v62 }
 0x308   : > { %v4446_v33 = vld [vmem:[#allocation2 + $0x10] sm:$0xff] }
 0x369   : > { %v941_v63 = vpop.f32.mrb[2].mxu1 }
 0x36a   : > { %v3135_v0 = vpop.f32.mrb[3].mxu1  ;;  %v946_v1 = vsel %vm587_vm2, %v941_v63, -inf }
 0x36b   : > { %947 = vmax.xlane.f32.xlu1 %v946_v1  ;;  %v4510_v1 = vld [vmem:[#allocation3 + $0x18] sm:$0xff] }
 0x3f8   : > { %v948_v5 = vpop.xlane.xlu1 %947 }
 0x3f9   : > { %v4416_v6 = vmax.f32 %v4413_v4, %v948_v5 }
 0x3fb   : > { %v950_v9 = vsub.f32 %v4413_v4, %v4416_v6  ;;  %1050 = vst.msk [vmem:[#allocation3] sm:$0xff] %vm578_vm3, %v4416_v6  ;;  %955 = vperm.xlu1 %3464, %v4416_v6  }
 0x3ff   : > { %705 = vrot.lane.b32.xlu1 %v699_v53, %s3888_s30 }
 0x403   : > { %1052 = vrot.lane.b32.xlu1 %v790_v54, %s3888_s30 }
 0x407   : > { %715 = vrot.lane.b32.xlu1 %v699_v53, %s3889_s1 }
 0x40b   : > { %1243 = vrot.lane.b32.xlu1 %v790_v54, %s3885_s11 }
 0x40f   : > { %1433 = vrot.lane.b32.xlu1 %v790_v54, %s3889_s1 }
 0x47a   : > { %v956_v18 = vpop.permute.xlu1 %955 }
 0x47b   : > { %v958_v21 = vsub.f32 %v941_v63, %v956_v18 }
 0x47d   : > { %v959_v22 = vmul.f32 1.442695, %v958_v21 }
 0x47e   : > { %v706_v23 = vpop.permute.xlu1 %705 }
 0x47f   : > { %3500 = vpow2.f32 %v959_v22  ;;  %709 = vst.msk [vmem:[#allocation2 + $0x8] sm:$0xff] %vm587_vm2, %v706_v23 }
 0x480   : > { %3502 = vrsqrt.f32 %v1653_v24 }
 0x482   : > { %v1053_v25 = vpop.permute.xlu1 %1052 }
 0x486   : > { %v716_v26 = vpop.permute.xlu1 %715  ;;  %v4444_v32 = vld [vmem:[#allocation2 + $0x8] sm:$0xff] }
 0x487   : > { %719 = vst.msk [vmem:[#allocation2 + $0x18] sm:$0xff] %vm587_vm2, %v716_v26 }
 0x489   : > { %v4431_v27 = vpop.eup %3500 }
 0x48a   : > { %3139 = vmatmul.mubr.msk.f32.vlgmr.msra.gmra.mrb[4].mxu1 %vm587_vm2, %v4431_v27  ;;  %v1244_v28 = vpop.permute.xlu1 %1243  ;;  %v3503_v31 = vpop.eup %3502 }
 0x48b   : > { %3142 = vmatpush3.xpose.msk.msra.mxu1 %vm587_vm2, %v1053_v25  ;;  %3152 = vmatpush3.xpose.msk.msra.mxu0 %vm587_vm2, %v1244_v28  ;;  %v1657_v36 = vmul.f32 %v3503_v31, %v1651_v30 }
 0x48c   : > { %3143 = vmatprep.mubr.msk.f32.mxu1 %vm3883_vm1, %v3884_v15  ;;  %3161 = vmatprep.subr.mxu0 %v3884_v15 }
 0x48d   : > { %3146 = vmatprep.subr.mxu1 %v3884_v15  ;;  %v1665_v39 = vmul.f32 %v2998_v29, %v1657_v36 }
 0x48e   : > { %3144 = vmatmul.mubr.msk.f32.vlgmr.msra.gmra.mrb[6].mxu1 %vm587_vm2, %v4444_v32  ;;  %3154 = vmatmul.mubr.msk.f32.vlgmr.msra.gmra.mrb[4].mxu0 %vm587_vm2, %v4446_v33  ;;  %v1434_v19 = vpop.permute.xlu1 %1433  ;;  %v4462_v37 = vld [vmem:[#allocation2 + $0x18] sm:$0xff] }
 0x48f   : > { %3162 = vmatpush3.xpose.msk.msra.mxu0 %vm587_vm2, %v1434_v19  ;;  %3163 = vmatprep.mubr.msk.f32.mxu0 %vm3883_vm1, %v3884_v15  ;;  %v4473_v40 = vadd.f32 %v2999_v35, %v1665_v39  ;;  %v4566_v19 = vld [vmem:[#allocation3] sm:$0xff] }
 0x490   : > { %3279 = vmatprep.subr.bf16.mxu0 %v4318_v12  ;;  %3148 = vmatprep.mubr.msk.f32.mxu1 %vm3883_vm1, %v3884_v15 }
 0x492   : > { %3164 = vmatmul.mubr.msk.f32.vlgmr.msra.gmra.mrb[6].mxu0 %vm587_vm2, %v4462_v37 }
 0x493   : > { %3281 = vmatpush3.bf16.msra.mxu0 %v4318_v12  ;;  %3179 = vmatprep.mubr.msk.f32.mxu0 %vm595_vm0, %v4464_v38 }
 0x494   : > { %3283 = vmatprep.subr.bf16.mxu0 %v4326_v17 }
 0x497   : > { %3285 = vmatpush3.bf16.msra.mxu0 %v4326_v17 }
 0x498   : > { %3294 = vmatprep.subr.bf16.mxu0 %v3882_v7 }
 0x49a   : > { %3180 = vmatmul.mubr.msk.f32.vlgmr.msra.gmra.mrb[8].mxu0 %vm595_vm0, %v4473_v40 }
 0x49b   : > { %3197 = vmatprep.mubr.msk.f32.mxu0 %vm3883_vm1, %v3884_v15 }
 0x55d   : > { %v4480_v42 = vpop.f32.mrb[4].mxu1 }
 0x55e   : > { %v3140_v12 = vpop.f32.mrb[5].mxu1 }
 0x561   : > { %v1125_v43 = vpop.f32.mrb[6].mxu1  ;;  %v1316_v44 = vpop.f32.mrb[4].mxu0 }
 0x562   : > { %v3145_v46 = vpop.f32.mrb[7].mxu1  ;;  %v3155_v47 = vpop.f32.mrb[5].mxu0  ;;  %v1131_v48 = vsel %vm587_vm2, %v1125_v43, -inf  ;;  %v1322_v17 = vsel %vm587_vm2, %v1316_v44, -inf }
 0x563   : > { %1132 = vmax.xlane.f32.xlu1 %v1131_v48  ;;  %1323 = vmax.xlane.f32.xlu0 %v1322_v17 }
 0x565   : > { %v1506_v49 = vpop.f32.mrb[6].mxu0 }
 0x566   : > { %v3165_v50 = vpop.f32.mrb[7].mxu0  ;;  %v1512_v51 = vsel %vm587_vm2, %v1506_v49, -inf }
 0x567   : > { %1513 = vmax.xlane.f32.xlu0 %v1512_v51 }
 0x56d   : > { %v3181_v52 = vpop.f32.mrb[8].mxu0 }
 0x56e   : > { %v1750_v53 = vpop.f32.mrb[9].mxu0 }
 0x56f   : > { %v3295_v55 = vpack.c.bf16 %v3181_v52, %v1750_v53  ;;  %v4491_v56 = vpack.i.bf16 %v3181_v52, %v1750_v53 }
 0x571   : > { %3297 = vmatpush3.bf16.xpose.msk.msra.mxu0 %vm4487_vm4, %v3295_v55 }
 0x572   : > { %3305 = vmatprep.subr.bf16.mxu0 %v3882_v7 }
 0x578   : > { %3198 = vmatmul.mubr.msk.f32.vlgmr.msra.gmra.mrb[10].mxu0 %vm587_vm2, %v4391_v58 }
 0x579   : > { %3218 = vmatprep.mubr.msk.f32.mxu0 %vm3883_vm1, %v3884_v15 }
 0x5f0   : > { %v1324_v61 = vpop.xlane.xlu0 %1323  ;;  %v1133_v62 = vpop.xlane.xlu1 %1132 }
 0x5f1   : > { %v4505_v63 = vmax.f32 %v4500_v59, %v1324_v61  ;;  %v4508_v0 = vmax.f32 %v4502_v60, %v1133_v62 }
 0x5f3   : > { %v1326_v58 = vsub.f32 %v4500_v59, %v4505_v63  ;;  %1431 = vst.msk [vmem:[#allocation3 + $0x10] sm:$0xff] %vm578_vm3, %v4505_v63  ;;  %v1135_v2 = vsub.f32 %v4502_v60, %v4508_v0  ;;  %1241 = vst.msk [vmem:[#allocation3 + $0x8] sm:$0xff] %vm578_vm3, %v4508_v0  ;;  %1331 = vperm.xlu0 %3465, %v4505_v63   ;;  %1140 = vperm.xlu1 %3464, %v4508_v0   ;;  %v1528_v63 = vld [vmem:[#allocation4 + $0x18] sm:$0xff] }
 0x5f4   : > { %v1514_v3 = vpop.xlane.xlu0 %1513 }
 0x5f5   : > { %v4523_v5 = vmax.f32 %v4510_v1, %v1514_v3 }
 0x5f7   : > { %v1516_v8 = vsub.f32 %v4510_v1, %v4523_v5  ;;  %1621 = vst.msk [vmem:[#allocation3 + $0x18] sm:$0xff] %vm578_vm3, %v4523_v5  ;;  %1521 = vperm.xlu1 %3464, %v4523_v5  }
 0x5fb   : > { %1163 = vrot.lane.b32.xlu1 %v4389_v57, %s3888_s30 }
 0x5ff   : > { %1353 = vrot.lane.b32.xlu1 %v4389_v57, %s3885_s11 }
 0x603   : > { %1543 = vrot.lane.b32.xlu1 %v4389_v57, %s3889_s1 }
 0x64b   : > { %v1915_v10 = vpop.f32.mrb[10].mxu0 }
 0x64c   : > { %v3199_v11 = vpop.f32.mrb[11].mxu0  ;;  %v1921_v13 = vsel %vm1920_vm5, %v1915_v10, -inf }
 0x64d   : > { %1922 = vmax.xlane.f32.xlu1 %v1921_v13  ;;  %v4605_v13 = vld [vmem:[#allocation3 + $0x8] sm:$0xff] }
 0x672   : > { %v1332_v14 = vpop.permute.xlu0 %1331  ;;  %v1141_v16 = vpop.permute.xlu1 %1140 }
 0x673   : > { %v1143_v18 = vsub.f32 %v1125_v43, %v1141_v16  ;;  %v1334_v20 = vsub.f32 %v1316_v44, %v1332_v14 }
 0x675   : > { %v1144_v21 = vmul.f32 1.442695, %v1143_v18  ;;  %v1335_v23 = vmul.f32 1.442695, %v1334_v20 }
 0x676   : > { %v1522_v22 = vpop.permute.xlu1 %1521 }
 0x677   : > { %3504 = vpow2.f32 %v1144_v21  ;;  %v1524_v24 = vsub.f32 %v1506_v49, %v1522_v22 }
 0x678   : > { %3506 = vpow2.f32 %v1335_v23 }
 0x679   : > { %v1525_v26 = vmul.f32 1.442695, %v1524_v24 }
 0x67a   : > { %v1164_v25 = vpop.permute.xlu1 %1163 }
 0x67b   : > { %3147 = vmatpush3.msra.mxu1 %v1164_v25  ;;  %3508 = vpow2.f32 %v1525_v26 }
 0x67c   : > { %3156 = vmatprep.subr.mxu1 %v3884_v15 }
 0x67e   : > { %v1354_v57 = vpop.permute.xlu1 %1353 }
 0x681   : > { %v4538_v28 = vpop.eup %3504 }
 0x682   : > { %3149 = vmatmul.mubr.msk.f32.vlgmr.msra.gmra.mrb[8].mxu1 %vm587_vm2, %v4538_v28  ;;  %v4545_v29 = vpop.eup %3506  ;;  %v1544_v30 = vpop.permute.xlu1 %1543 }
 0x683   : > { %3157 = vmatpush3.msra.mxu1 %v1354_v57  ;;  %3158 = vmatprep.mubr.msk.f32.mxu1 %vm3883_vm1, %v3884_v15 }
 0x684   : > { %3166 = vmatprep.subr.mxu1 %v3884_v15 }
 0x685   : > { %v4552_v31 = vpop.eup %3508 }
 0x686   : > { %3159 = vmatmul.mubr.msk.f32.vlgmr.msra.gmra.mrb[10].mxu1 %vm587_vm2, %v4545_v29 }
 0x687   : > { %3167 = vmatpush3.msra.mxu1 %v1544_v30  ;;  %3168 = vmatprep.mubr.msk.f32.mxu1 %vm3883_vm1, %v3884_v15 }
 0x688   : > { %3287 = vmatprep.subr.bf16.mxu1 %v4362_v41 }
 0x68a   : > { %3169 = vmatmul.mubr.msk.f32.vlgmr.msra.gmra.mrb[12].mxu1 %vm587_vm2, %v4552_v31 }
 0x68b   : > { %3289 = vmatpush3.bf16.msra.mxu1 %v4362_v41  ;;  %3190 = vmatprep.mubr.msk.f32.mxu1 %vm595_vm0, %v4464_v38 }
 0x68c   : > { %3291 = vmatprep.subr.bf16.mxu1 %v4373_v45 }
 0x68f   : > { %3293 = vmatpush3.bf16.msra.mxu1 %v4373_v45 }
 0x690   : > { %3298 = vmatprep.subr.bf16.mxu1 %v3882_v7 }
 0x692   : > { %3191 = vmatmul.mubr.msk.f32.vlgmr.msra.gmra.mrb[14].mxu1 %vm595_vm0, %v4473_v40 }
 0x693   : > { %3204 = vmatprep.mubr.msk.f32.mxu1 %vm3883_vm1, %v3884_v15 }
 0x6da   : > { %v1923_v34 = vpop.xlane.xlu1 %1922 }
 0x6db   : > { %v4569_v41 = vmax.f32 %v4566_v19, %v1923_v34 }
 0x6dd   : > { %v1925_v35 = vsub.f32 %v4566_v19, %v4569_v41  ;;  %2026 = vst.msk [vmem:[#allocation3] sm:$0xff] %vm578_vm3, %v4569_v41  ;;  %1930 = vperm.xlu0 %3465, %v4569_v41  }
 0x6e1   : > { %3467 = vrot.lane.b32.xlu0 %v4491_v56, %s3888_s30 }
 0x755   : > { %v4578_v45 = vpop.f32.mrb[8].mxu1 }
 0x756   : > { %v3150_v36 = vpop.f32.mrb[9].mxu1 }
 0x759   : > { %v4580_v38 = vpop.f32.mrb[10].mxu1 }
 0x75a   : > { %v3160_v39 = vpop.f32.mrb[11].mxu1 }
 0x75c   : > { %v1931_v40 = vpop.permute.xlu0 %1930 }
 0x75d   : > { %v1933_v12 = vsub.f32 %v1915_v10, %v1931_v40  ;;  %v4582_v43 = vpop.f32.mrb[12].mxu1 }
 0x75e   : > { %v3170_v46 = vpop.f32.mrb[13].mxu1 }
 0x75f   : > { %v1934_v44 = vmul.f32 1.442695, %v1933_v12 }
 0x760   : > { %v3468_v50 = vpop.permute.xlu0 %3467 }
 0x761   : > { %3510 = vpow2.f32 %v1934_v44  ;;  %v3470_v52 = vunpack.i.h.bf16 %v3468_v50  ;;  %v3469_v53 = vunpack.i.l.bf16 %v3468_v50 }
 0x763   : > { %v3302_v55 = vpack.c.bf16 %v3470_v52, %v3469_v53 }
 0x765   : > { %v3192_v47 = vpop.f32.mrb[14].mxu1 }
 0x766   : > { %v1829_v48 = vpop.f32.mrb[15].mxu1 }
 0x767   : > { %v3299_v17 = vpack.c.bf16 %v3192_v47, %v1829_v48  ;;  %v4584_v49 = vpack.i.bf16 %v3192_v47, %v1829_v48  ;;  %v2311_v47 = vld [vmem:[#allocation3 + $0x10] sm:$0xff] }
 0x769   : > { %3300 = vmatpush3.bf16.msra.mxu1 %v3299_v17 }
 0x76a   : > { %3301 = vmatprep.subr.bf16.mxu1 %v3882_v7 }
 0x76b   : > { %v4586_v51 = vpop.eup %3510 }
 0x76c   : > { %3205 = vmatmul.mubr.msk.f32.vlgmr.msra.gmra.mrb[16].mxu1 %vm1920_vm5, %v4586_v51 }
 0x76d   : > { %3211 = vmatprep.mubr.msk.f32.mxu1 %vm3883_vm1, %v3884_v15 }
 0x772   : > { %3304 = vmatpush3.bf16.xpose.msk.msra.mxu1 %vm4487_vm4, %v3302_v55 }
 0x773   : > { %3312 = vmatprep.subr.bf16.mxu1 %v3882_v7 }
 0x779   : > { %3212 = vmatmul.mubr.msk.f32.vlgmr.msra.gmra.mrb[18].mxu1 %vm587_vm2, %v4444_v32 }
 0x77a   : > { %3232 = vmatprep.mubr.msk.f32.mxu1 %vm3883_vm1, %v3884_v15 }
 0x83f   : > { %v4600_v61 = vpop.f32.mrb[16].mxu1 }
 0x840   : > { %v3206_v62 = vpop.f32.mrb[17].mxu1 }
 0x84c   : > { %v2106_v3 = vpop.f32.mrb[18].mxu1 }
 0x84d   : > { %v3213_v10 = vpop.f32.mrb[19].mxu1  ;;  %v2112_v11 = vsel %vm1920_vm5, %v2106_v3, -inf }
 0x84e   : > { %2113 = vmax.xlane.f32.xlu0 %v2112_v11 }
 0x864   : > { %3477 = vrot.lane.b32.xlu0 %v4491_v56, %s3885_s11 }
 0x8db   : > { %v2114_v14 = vpop.xlane.xlu0 %2113 }
 0x8dc   : > { %v4608_v16 = vmax.f32 %v4605_v13, %v2114_v14 }
 0x8de   : > { %v2116_v32 = vsub.f32 %v4605_v13, %v4608_v16  ;;  %2226 = vst.msk [vmem:[#allocation3 + $0x8] sm:$0xff] %vm578_vm3, %v4608_v16  ;;  %2121 = vperm.xlu1 %3464, %v4608_v16   ;;  %v1346_v16 = vld [vmem:[#allocation5 + $0x10] sm:$0xff] }
 0x8df   : > { %v3478_v26 = vpop.permute.xlu0 %3477 }
 0x8e0   : > { %v3480_v57 = vunpack.i.h.bf16 %v3478_v26  ;;  %v3479_v30 = vunpack.i.l.bf16 %v3478_v26  ;;  %v1340_v26 = vsel %vm587_vm2, %v4545_v29, 0.0  ;;  %v1517_v29 = vmul.f32 1.442695, %v1516_v8 }
 0x8e2   : > { %3472 = vrot.lane.b32.xlu1 %v4584_v49, %s3888_s30  ;;  %v3309_v36 = vpack.c.bf16 %v3480_v57, %v3479_v30  ;;  %v1530_v57 = vsel %vm587_vm2, %v4552_v31, 0.0  ;;  %v1327_v30 = vmul.f32 1.442695, %v1326_v58  ;;  %v2509_v31 = vld [vmem:[#allocation3 + $0x18] sm:$0xff]  ;;  %s3776_s30 = sshll.u32 %s3893_s15, 4  ;;  %s3777_s30 = int_to_ptr.vmem [resolvable:$false] %s3776_s30 }
 0x8e3   : > { %p3779_p2 = scmp.lt.s32.totalorder %s4722_s13, %s3777_s30 }
 0x95d   : > { %v2122_v18 = vpop.permute.xlu1 %2121 }
 0x95e   : > { %v2124_v20 = vsub.f32 %v2106_v3, %v2122_v18 }
 0x960   : > { %v2125_v21 = vmul.f32 1.442695, %v2124_v20 }
 0x961   : > { %v3473_v22 = vpop.permute.xlu1 %3472 }
 0x962   : > { %3512 = vpow2.f32 %v2125_v21  ;;  %v3475_v23 = vunpack.i.h.bf16 %v3473_v22  ;;  %v3474_v24 = vunpack.i.l.bf16 %v3473_v22 }
 0x964   : > { %v3306_v25 = vpack.c.bf16 %v3475_v23, %v3474_v24 }
 0x966   : > { %3307 = vmatpush3.bf16.msra.mxu0 %v3306_v25 }
 0x967   : > { %3308 = vmatprep.subr.bf16.mxu0 %v3882_v7 }
 0x96c   : > { %v3513_v34 = vpop.eup %3512 }
 0x96d   : > { %3219 = vmatmul.mubr.msk.f32.vlgmr.msra.gmra.mrb[12].mxu0 %vm1920_vm5, %v3513_v34  ;;  %v2130_v54 = vsel %vm1920_vm5, %v3513_v34, 0.0 }
 0x96e   : > { %3225 = vmatprep.mubr.msk.f32.mxu0 %vm3883_vm1, %v3884_v15 }
 0x96f   : > { %3311 = vmatpush3.bf16.xpose.msk.msra.mxu0 %vm4487_vm4, %v3309_v36 }
 0x970   : > { %3319 = vmatprep.subr.bf16.mxu0 %v3882_v7 }
 0x976   : > { %3226 = vmatmul.mubr.msk.f32.vlgmr.msra.gmra.mrb[14].mxu0 %vm587_vm2, %v4446_v33 }
 0x977   : > { %3246 = vmatprep.mubr.msk.f32.mxu0 %vm3883_vm1, %v3884_v15 }
 0xa40   : > { %v4628_v39 = vpop.f32.mrb[12].mxu0 }
 0xa41   : > { %v3220_v40 = vpop.f32.mrb[13].mxu0 }
 0xa49   : > { %v2306_v12 = vpop.f32.mrb[14].mxu0 }
 0xa4a   : > { %v3227_v44 = vpop.f32.mrb[15].mxu0  ;;  %v2312_v46 = vsel %vm1920_vm5, %v2306_v12, -inf }
 0xa4b   : > { %2313 = vmax.xlane.f32.xlu1 %v2312_v46  ;;  %v1338_v44 = vld [vmem:[#allocation4 + $0x10] sm:$0xff] }
 0xad8   : > { %v2314_v48 = vpop.xlane.xlu1 %2313 }
 0xad9   : > { %v2315_v17 = vmax.f32 %v2311_v47, %v2314_v48 }
 0xadb   : > { %v2316_v50 = vsub.f32 %v2311_v47, %v2315_v17  ;;  %2424 = vst.msk [vmem:[#allocation3 + $0x10] sm:$0xff] %vm578_vm3, %v2315_v17  ;;  %2321 = vperm.xlu0 %3465, %v2315_v17  }
 0xadd   : > { %v2317_v40 = vmul.f32 1.442695, %v2316_v50 }
 0xadf   : > { %3482 = vrot.lane.b32.xlu0 %v4584_v49, %s3885_s11  ;;  %s3772_s11 = scalar_lea.vmem %s4722_s13, 128 }
 0xae0   : > { %p3773_p9 = scmp.ne.s32.totalorder %s4722_s13, %s3772_s11 }
 0xae2   : > { %p3774_p0 = pnand %p3773_p9, %p4859_p13 }
 0xae3   : > { %3487 = vrot.lane.b32.xlu0 %v4491_v56, %s3889_s1 }
 0xae4   : > { %p3775_p5 = pneg %p3774_p0 }
 0xb5a   : > { %v2322_v33 = vpop.permute.xlu0 %2321 }
 0xb5b   : > { %v2324_v52 = vsub.f32 %v2306_v12, %v2322_v33 }
 0xb5d   : > { %v2325_v53 = vmul.f32 1.442695, %v2324_v52 }
 0xb5e   : > { %v3483_v55 = vpop.permute.xlu0 %3482 }
 0xb5f   : > { %3514 = vpow2.f32 %v2325_v53  ;;  %v3485_v62 = vunpack.i.h.bf16 %v3483_v55  ;;  %v3484_v3 = vunpack.i.l.bf16 %v3483_v55 }
 0xb60   : > { %3516 = vpow2.f32 %v1327_v30 }
 0xb61   : > { %v3313_v10 = vpack.c.bf16 %v3485_v62, %v3484_v3  ;;  %3518 = vpow2.f32 %v1517_v29  ;;  %v1149_v62 = vsel %vm587_vm2, %v4538_v28, 0.0  ;;  %v1536_v29 = vld [vmem:[#allocation5 + $0x18] sm:$0xff] }
 0xb62   : > { %v3488_v11 = vpop.permute.xlu0 %3487  ;;  %3520 = vpow2.f32 %v2317_v40 }
 0xb63   : > { %3314 = vmatpush3.bf16.msra.mxu1 %v3313_v10  ;;  %v3490_v14 = vunpack.i.h.bf16 %v3488_v11  ;;  %v3489_v18 = vunpack.i.l.bf16 %v3488_v11 }
 0xb64   : > { %3315 = vmatprep.subr.bf16.mxu1 %v3882_v7 }
 0xb65   : > { %v3316_v21 = vpack.c.bf16 %v3490_v14, %v3489_v18 }
 0xb69   : > { %v3515_v20 = vpop.eup %3514 }
 0xb6a   : > { %3233 = vmatmul.mubr.msk.f32.vlgmr.msra.gmra.mrb[20].mxu1 %vm1920_vm5, %v3515_v20  ;;  %v3517_v36 = vpop.eup %3516 }
 0xb6b   : > { %3239 = vmatprep.mubr.msk.f32.mxu1 %vm3883_vm1, %v3884_v15  ;;  %v1339_v47 = vmul.f32 %v3517_v36, %v1338_v44  ;;  %v3519_v48 = vpop.eup %3518 }
 0xb6c   : > { %3318 = vmatpush3.bf16.xpose.msk.msra.mxu1 %vm4487_vm4, %v3316_v21  ;;  %v1529_v1 = vmul.f32 %v3519_v48, %v1528_v63  ;;  %v3521_v50 = vpop.eup %3520 }
 0xb73   : > { %3240 = vmatmul.mubr.msk.f32.vlgmr.msra.gmra.mrb[22].mxu1 %vm587_vm2, %v4462_v37  ;;  %v2330_v37 = vsel %vm1920_vm5, %v3515_v20, 0.0 }
 0xc3d   : > { %v4644_v56 = vpop.f32.mrb[20].mxu1 }
 0xc3e   : > { %v3234_v22 = vpop.f32.mrb[21].mxu1 }
 0xc3f   : > { %v963_v22 = vsel %vm587_vm2, %v4431_v27, 0.0  ;;  %v951_v27 = vmul.f32 1.442695, %v950_v9 }
 0xc46   : > { %v2504_v23 = vpop.f32.mrb[22].mxu1 }
 0xc47   : > { %v3241_v24 = vpop.f32.mrb[23].mxu1  ;;  %v2510_v25 = vsel %vm1920_vm5, %v2504_v23, -inf }
 0xc48   : > { %2511 = vmax.xlane.f32.xlu0 %v2510_v25  ;;  %v1136_v24 = vmul.f32 1.442695, %v1135_v2  ;;  %v2117_v25 = vmul.f32 1.442695, %v2116_v32 }
 0xc4c   : > { %1341 = vadd.xlane.f32.xlu0 %v1340_v26 }
 0xc50   : > { %1531 = vadd.xlane.f32.xlu0 %v1530_v57 }
 0xc54   : > { %2131 = vadd.xlane.f32.xlu0 %v2130_v54  ;;  %v1147_v54 = vld [vmem:[#allocation4 + $0x8] sm:$0xff] }
 0xc58   : > { %2331 = vadd.xlane.f32.xlu0 %v2330_v37 }
 0xcd5   : > { %v2512_v12 = vpop.xlane.xlu0 %2511 }
 0xcd6   : > { %v2513_v34 = vmax.f32 %v2509_v31, %v2512_v12 }
 0xcd8   : > { %v2514_v46 = vsub.f32 %v2509_v31, %v2513_v34  ;;  %2622 = vst.msk [vmem:[#allocation3 + $0x18] sm:$0xff] %vm578_vm3, %v2513_v34  ;;  %2519 = vperm.xlu1 %3464, %v2513_v34  }
 0xcd9   : > { %v1342_v59 = vpop.xlane.xlu0 %1341 }
 0xcda   : > { %v1343_v58 = vadd.f32 %v1342_v59, %v1339_v47  ;;  %v2515_v26 = vmul.f32 1.442695, %v2514_v46 }
 0xcdc   : > { %1344 = vst.msk [vmem:[#allocation4 + $0x10] sm:$0xff] %vm578_vm3, %v1343_v58  ;;  %3492 = vrot.lane.b32.xlu1 %v4584_v49, %s3889_s1  ;;  %s3778_s1 = scalar_lea.vmem %s3777_s30, 256 }
 0xcdd   : > { %v1532_v5 = vpop.xlane.xlu0 %1531  ;;  %p3780_p7 = scmp.lt.s32.totalorder %s3778_s1, %s3772_s11 }
 0xcde   : > { %v1533_v8 = vadd.f32 %v1532_v5, %v1529_v1  ;;  %v961_v5 = vld [vmem:[#allocation4] sm:$0xff] }
 0xcdf   : > { %p3781_p6 = por %p3780_p7, %p3779_p2 }
 0xce0   : > { %1534 = vst.msk [vmem:[#allocation4 + $0x18] sm:$0xff] %vm578_vm3, %v1533_v8 }
 0xce1   : > { %v4664_v17 = vpop.xlane.xlu0 %2131  ;;  %p3782_p10 = pnand %p3781_p6, %p3775_p5 }
 0xce3   : > { %v2328_v33 = vld [vmem:[#allocation4 + $0x10] sm:$0xff] }
 0xce4   : > { %v2329_v52 = vmul.f32 %v3521_v50, %v2328_v33 }
 0xce5   : > { %v2332_v53 = vpop.xlane.xlu0 %2331 }
 0xce6   : > { %v2333_v55 = vadd.f32 %v2332_v53, %v2329_v52 }
 0xce7   : > { %v2526_v63 = vld [vmem:[#allocation4 + $0x18] sm:$0xff] }
 0xce8   : > { %2334 = vst.msk [vmem:[#allocation4 + $0x10] sm:$0xff] %vm578_vm3, %v2333_v55 }
 0xd00   : > { %1150 = vadd.xlane.f32.xlu1 %v1149_v62  ;;  %v1155_v62 = vld [vmem:[#allocation5 + $0x8] sm:$0xff] }
 0xd11   : > { %1349 = vperm.xlu1 %3464, %v3517_v36  }
 0xd15   : > { %1539 = vperm.xlu1 %3464, %v3519_v48  }
 0xd19   : > { %2339 = vperm.xlu1 %3464, %v3521_v50  }
 0xd57   : > { %v2520_v49 = vpop.permute.xlu1 %2519 }
 0xd58   : > { %v2522_v3 = vsub.f32 %v2504_v23, %v2520_v49  ;;  %v1938_v23 = vsel %vm1920_vm5, %v4586_v51, 0.0 }
 0xd5a   : > { %v2523_v10 = vmul.f32 1.442695, %v2522_v3 }
 0xd5b   : > { %v3493_v11 = vpop.permute.xlu1 %3492 }
 0xd5c   : > { %3522 = vpow2.f32 %v2523_v10  ;;  %v3495_v14 = vunpack.i.h.bf16 %v3493_v11  ;;  %v3494_v18 = vunpack.i.l.bf16 %v3493_v11 }
 0xd5d   : > { %3524 = vpow2.f32 %v1136_v24 }
 0xd5e   : > { %v3320_v20 = vpack.c.bf16 %v3495_v14, %v3494_v18  ;;  %3526 = vpow2.f32 %v2117_v25 }
 0xd5f   : > { %3528 = vpow2.f32 %v2515_v26 }
 0xd60   : > { %3321 = vmatpush3.bf16.msra.mxu0 %v3320_v20 }
 0xd61   : > { %3322 = vmatprep.subr.bf16.mxu0 %v3882_v7 }
 0xd66   : > { %v3523_v21 = vpop.eup %3522 }
 0xd67   : > { %3247 = vmatmul.mubr.msk.f32.vlgmr.msra.gmra.mrb[16].mxu0 %vm1920_vm5, %v3523_v21  ;;  %v2528_v28 = vsel %vm1920_vm5, %v3523_v21, 0.0  ;;  %v3525_v57 = vpop.eup %3524 }
 0xd68   : > { %2529 = vadd.xlane.f32.xlu0 %v2528_v28  ;;  %3257 = vmatprep.mubr.msk.f32.mxu0 %vm3883_vm1, %v3884_v15  ;;  %v2653_v15 = vld [vmem:[#allocation4 + $0x10] sm:$0xff]  ;;  %v3527_v51 = vpop.eup %3526  ;;  %v1148_v60 = vmul.f32 %v3525_v57, %v1147_v54 }
 0xd69   : > { %3530 = vrcp.f32 %v2653_v15  ;;  %v3529_v0 = vpop.eup %3528 }
 0xd6a   : > { %3532 = vpow2.f32 %v951_v27  ;;  %v2527_v58 = vmul.f32 %v3529_v0, %v2526_v63 }
 0xd6c   : > { %964 = vadd.xlane.f32.xlu0 %v963_v22  ;;  %v968_v22 = vld [vmem:[#allocation5] sm:$0xff] }
 0xd70   : > { %1939 = vadd.xlane.f32.xlu0 %v1938_v23 }
 0xd73   : > { %v3531_v32 = vpop.eup %3530 }
 0xd74   : > { %v3533_v6 = vpop.eup %3532 }
 0xd86   : > { %1158 = vperm.xlu0 %3465, %v3525_v57  }
 0xd8a   : > { %2139 = vperm.xlu0 %3465, %v3527_v51  }
 0xd8d   : > { %v1151_v2 = vpop.xlane.xlu1 %1150 }
 0xd8e   : > { %v1152_v13 = vadd.f32 %v1151_v2, %v1148_v60  ;;  %2537 = vperm.xlu0 %3465, %v3529_v0  }
 0xd90   : > { %1153 = vst.msk [vmem:[#allocation4 + $0x8] sm:$0xff] %vm578_vm3, %v1152_v13 }
 0xd91   : > { %v1350_v37 = vpop.permute.xlu1 %1349 }
 0xd92   : > { %v1352_v30 = vmul.f32 %v1350_v37, %v1346_v16  ;;  %2659 = vperm.xlu0 %3465, %v3531_v32   ;;  %v2687_v16 = vld [vmem:[#allocation19 + $0x8] sm:$0xff]  ;;  %v2688_v37 = vld [vmem:[#allocation19 + $0x10] sm:$0xff] }
 0xd94   : > { %v1429_v4 = vadd.f32 %v4580_v38, %v1352_v30  ;;  %v2689_v30 = vld [vmem:[#allocation19 + $0x18] sm:$0xff] }
 0xd95   : > { %v1540_v9 = vpop.permute.xlu1 %1539 }
 0xd96   : > { %1430 = vst.msk [vmem:[#allocation5 + $0x10] sm:$0xff] %vm587_vm2, %v1429_v4  ;;  %v1542_v36 = vmul.f32 %v1540_v9, %v1536_v29  ;;  %971 = vperm.xlu0 %3465, %v3533_v6   ;;  %v3326_v29 = vpack.c.bf16 %v2689_v30, %v2688_v37 }
 0xd97   : > { %v2128_v40 = vld [vmem:[#allocation4 + $0x8] sm:$0xff] }
 0xd98   : > { %v2129_v31 = vmul.f32 %v3527_v51, %v2128_v40  ;;  %v1619_v12 = vadd.f32 %v4582_v43, %v1542_v36  ;;  %v1926_v43 = vmul.f32 1.442695, %v1925_v35 }
 0xd99   : > { %v2340_v46 = vpop.permute.xlu1 %2339 }
 0xd9a   : > { %v2133_v44 = vadd.f32 %v4664_v17, %v2129_v31  ;;  %1620 = vst.msk [vmem:[#allocation5 + $0x18] sm:$0xff] %vm587_vm2, %v1619_v12  ;;  %v962_v17 = vmul.f32 %v3533_v6, %v961_v5 }
 0xd9c   : > { %2134 = vst.msk [vmem:[#allocation4 + $0x8] sm:$0xff] %vm578_vm3, %v2133_v44 }
 0xd9d   : > { %v2336_v34 = vld [vmem:[#allocation5 + $0x10] sm:$0xff] }
 0xd9e   : > { %v2342_v47 = vmul.f32 %v2340_v46, %v2336_v34 }
 0xda0   : > { %v2422_v38 = vadd.f32 %v4644_v56, %v2342_v47 }
 0xda2   : > { %2423 = vst.msk [vmem:[#allocation5 + $0x10] sm:$0xff] %vm587_vm2, %v2422_v38 }
 0xda3   : > { %v2637_v48 = vld [vmem:[#allocation4 + $0x8] sm:$0xff] }
 0xda4   : > { %3534 = vrcp.f32 %v2637_v48 }
 0xda5   : > { %3536 = vpow2.f32 %v1926_v43 }
 0xda9   : > { %v2656_v15 = vld [vmem:[#allocation5 + $0x10] sm:$0xff] }
 0xdae   : > { %v3535_v59 = vpop.eup %3534 }
 0xdaf   : > { %2643 = vperm.xlu1 %3464, %v3535_v59   ;;  %v3537_v53 = vpop.eup %3536 }
 0xdf5   : > { %v2530_v1 = vpop.xlane.xlu0 %2529 }
 0xdf6   : > { %v2531_v8 = vadd.f32 %v2530_v1, %v2527_v58 }
 0xdf8   : > { %2532 = vst.msk [vmem:[#allocation4 + $0x18] sm:$0xff] %vm578_vm3, %v2531_v8 }
 0xdf9   : > { %v965_v56 = vpop.xlane.xlu0 %964 }
 0xdfa   : > { %v966_v50 = vadd.f32 %v965_v56, %v962_v17 }
 0xdfc   : > { %967 = vst.msk [vmem:[#allocation4] sm:$0xff] %vm578_vm3, %v966_v50 }
 0xdfd   : > { %v1940_v52 = vpop.xlane.xlu0 %1939 }
 0xdff   : > { %v2669_v33 = vld [vmem:[#allocation4 + $0x18] sm:$0xff] }
 0xe00   : > { %3538 = vrcp.f32 %v2669_v33 }
 0xe03   : > { %v1936_v55 = vld [vmem:[#allocation4] sm:$0xff] }
 0xe04   : > { %v1937_v49 = vmul.f32 %v3537_v53, %v1936_v55 }
 0xe05   : > { %v1159_v19 = vpop.permute.xlu0 %1158 }
 0xe06   : > { %v1941_v41 = vadd.f32 %v1940_v52, %v1937_v49  ;;  %v1161_v35 = vmul.f32 %v1159_v19, %v1155_v62 }
 0xe08   : > { %1943 = vst.msk [vmem:[#allocation4] sm:$0xff] %vm578_vm3, %v1941_v41  ;;  %v1239_v3 = vadd.f32 %v4578_v45, %v1161_v35 }
 0xe09   : > { %v2140_v10 = vpop.permute.xlu0 %2139 }
 0xe0a   : > { %v3539_v11 = vpop.eup %3538  ;;  %1240 = vst.msk [vmem:[#allocation5 + $0x8] sm:$0xff] %vm587_vm2, %v1239_v3 }
 0xe0b   : > { %2675 = vperm.xlu1 %3464, %v3539_v11  }
 0xe0d   : > { %v2538_v14 = vpop.permute.xlu0 %2537 }
 0xe0f   : > { %1947 = vperm.xlu1 %3464, %v3537_v53   ;;  %v2626_v18 = vld [vmem:[#allocation4] sm:$0xff] }
 0xe10   : > { %3540 = vrcp.f32 %v2626_v18 }
 0xe11   : > { %v2136_v20 = vld [vmem:[#allocation5 + $0x8] sm:$0xff]  ;;  %v2660_v21 = vpop.permute.xlu0 %2659 }
 0xe12   : > { %v2142_v28 = vmul.f32 %v2140_v10, %v2136_v20  ;;  %v2662_v57 = vmul.f32 %v2660_v21, %v2656_v15 }
 0xe14   : > { %v2224_v23 = vadd.f32 %v4628_v39, %v2142_v28  ;;  %v2534_v39 = vld [vmem:[#allocation5 + $0x18] sm:$0xff] }
 0xe15   : > { %v972_v24 = vpop.permute.xlu0 %971  ;;  %v2540_v60 = vmul.f32 %v2538_v14, %v2534_v39 }
 0xe16   : > { %2225 = vst.msk [vmem:[#allocation5 + $0x8] sm:$0xff] %vm587_vm2, %v2224_v23  ;;  %v974_v25 = vmul.f32 %v972_v24, %v968_v22 }
 0xe18   : > { %v1048_v45 = vadd.f32 %v4480_v42, %v974_v25  ;;  %v2686_v42 = vld [vmem:[#allocation19] sm:$0xff] }
 0xe19   : > { %v3323_v32 = vpack.c.bf16 %v2687_v16, %v2686_v42 }
 0xe1a   : > { %v3541_v26 = vpop.eup %3540  ;;  %1049 = vst.msk [vmem:[#allocation5] sm:$0xff] %vm587_vm2, %v1048_v45 }
 0xe1b   : > { %2632 = vperm.xlu0 %3465, %v3541_v26   ;;  %3324 = vmatpush3.bf16.msra.mxu0 %v3323_v32 }
 0xe1c   : > { %3325 = vmatprep.subr.bf16.mxu0 %v3882_v7 }
 0xe1d   : > { %v2640_v51 = vld [vmem:[#allocation5 + $0x8] sm:$0xff] }
 0xe1f   : > { %2664 = vrot.lane.b32.xlu0 %v2662_v57, %s3890_s5  ;;  %3327 = vmatpush3.bf16.msra.mxu0 %v3326_v29 }
 0xe21   : > { %v1944_v40 = vld [vmem:[#allocation5] sm:$0xff] }
 0xe2e   : > { %v2644_v27 = vpop.permute.xlu1 %2643 }
 0xe2f   : > { %v2646_v54 = vmul.f32 %v2644_v27, %v2640_v51 }
 0xe31   : > { %2648 = vrot.lane.b32.xlu1 %v2646_v54, %s3891_s28 }
 0xe3a   : > { %v2616_v0 = vpop.f32.mrb[16].mxu0 }
 0xe3b   : > { %v2620_v2 = vadd.f32 %v2616_v0, %v2540_v60  ;;  %v3248_v13 = vpop.f32.mrb[17].mxu0 }
 0xe3d   : > { %2621 = vst.msk [vmem:[#allocation5 + $0x18] sm:$0xff] %vm587_vm2, %v2620_v2 }
 0xe44   : > { %v2672_v6 = vld [vmem:[#allocation5 + $0x18] sm:$0xff] }
 0xe8a   : > { %v2676_v4 = vpop.permute.xlu1 %2675 }
 0xe8b   : > { %v2678_v9 = vmul.f32 %v2676_v4, %v2672_v6 }
 0xe8d   : > { %2680 = vrot.lane.b32.xlu1 %v2678_v9, %s3892_s24 }
 0xe8e   : > { %v1948_v36 = vpop.permute.xlu1 %1947 }
 0xe8f   : > { %v1950_v31 = vmul.f32 %v1948_v36, %v1944_v40 }
 0xe91   : > { %v2024_v12 = vadd.f32 %v4600_v61, %v1950_v31 }
 0xe93   : > { %2025 = vst.msk [vmem:[#allocation5] sm:$0xff] %vm587_vm2, %v2024_v12 }
 0xe9a   : > { %v2629_v44 = vld [vmem:[#allocation5] sm:$0xff]  ;;  %v2633_v34 = vpop.permute.xlu0 %2632 }
 0xe9b   : > { %v2635_v46 = vmul.f32 %v2633_v34, %v2629_v44 }
 0xe9d   : > { %2636 = vst.msk [vmem:[#allocation6] sm:$0xff] %vm587_vm2, %v2635_v46 }
 0xe9e   : > { %v2665_v47 = vpop.permute.xlu0 %2664 }
 0xea3   : > { %v2649_v7 = vpop.permute.xlu1 %2648 }
 0xea4   : > { %2652 = vst.msk [vmem:[#allocation6] sm:$0xff] %vm2651_vm6, %v2649_v7 }
 0xea5   : > { %2668 = vst.msk [vmem:[#allocation6] sm:$0xff] %vm2667_vm7, %v2665_v47 }
 0xeff   : > { %v2681_v38 = vpop.permute.xlu1 %2680 }
 0xf00   : > { %2684 = vst.msk [vmem:[#allocation6] sm:$0xff] %vm2683_vm8, %v2681_v38 }
 0xf07   : > { %v2685_v61 = vld [vmem:[#allocation6] sm:$0xff] }
 0xf08   : > { %3258 = vmatmul.mubr.msk.f32.vlgmr.msra.gmra.mrb[18].mxu0 %vm595_vm0, %v2685_v61 }
 0xfdb   : > { %v2759_v48 = vpop.f32.mrb[18].mxu0 }
 0xfdc   : > { %2763 = vst.msk [vmem:[%s572_s12] sm:$0xff] %vm595_vm0, %v2759_v48  ;;  %v3259_v59 = vpop.f32.mrb[19].mxu0 }
 0xfdd   : > { %3785 = shalt.err (!%p3782_p10)
}
 0xfde   : > { %s3786_s22 = scalar_lea.hbm %s4720_s16, 128  ;;  %s3790_s25 = scalar_lea.hbm %s4858_s27, 256 }
 0xfdf   : > { %p3787_p1 = scmp.ne.s32.totalorder %s4720_s16, %s3786_s22  ;;  %p3791_p11 = scmp.lt.u32.totalorder %s4720_s16, %s4858_s27 }
 0xfe0   : > { %p3792_p12 = scmp.lt.u32.totalorder %s3790_s25, %s3786_s22  ;;  %p3794_p9 = scmp.lt.u32.totalorder %s3786_s22, %s4720_s16 }
 0xfe1   : > { %p3788_p4 = pnand %p3787_p1, %p4859_p13 }
 0xfe2   : > { %p3793_p8 = por %p3792_p12, %p3791_p11 }
 0xfe3   : > { %p3789_p3 = pneg %p3788_p4 }
 0xfe4   : > { %p3795_p0 = por %p3794_p9, %p3793_p8 }
 0xfe6   : > { %p3796_p5 = pnand %p3795_p0, %p3789_p3 }
 0xfe8   : > { %3799 = shalt.err (!%p3796_p5)
}
 0xfe9   : > { %3354 = dma.vmem_to_hbm [thread:$0]  (%p4859_p13), %s4722_s13, 128, %s4720_s16, %s2765_s19  }
 0xfea PF: > { %s4860_s5 = sld [smem:[#allocation28_spill]]  ;;  %s4861_s28 = sld [smem:[#allocation35_spill]] }
 0xfeb   : > { %s4862_s24 = sld [smem:[#allocation31_spill]] }
 0xff0   : > { %s2791_s4 = sand.u32 1, %s4860_s5   ;;  %p4863_p2 = scmp.ne.s32.totalorder %s4861_s28, 0 }
 0xff1   : > { %p4864_p7 = scmp.ge.s32.totalorder %s4862_s24, 2  ;;  %s2792_s23 = scalar_lea.sflag [#allocation9], %s2791_s4 }
 0xff3   : > { %p3383_p6 = pnand %p4864_p7, %p4863_p2 }
 0xff5   : > { %3845 = dma.done.wait (!%p3383_p6), %s2792_s23, 128  }
 0xff6   : > { %3847 = vsyncadd (!%p3383_p6), %s2792_s23, 4294967168  ;;  %s33_s22 = sadd.s32 1, %s4862_s24   ;;  %s4865_s12 = sld [smem:[#allocation29_spill]] }
 0xff7   : > { %p30_p10 = scmp.ge.s32.totalorder %s33_s22, 4   ;;  %s4866_s19 = sld [smem:[#allocation34_spill]] }
 0xff8   : > { %s4867_s14 = sld [smem:[#allocation32_spill]]  ;;  %s4868_s17 = smov %s3854_s18 }
 0xff9   : > { %s4870_s20 = smov %s3866_s21  ;;  %32 = sbr.rel (!%p30_p10) target bundleno = 18 (0x12), region = 185 }
 0xffc   : > { %s4869_s18 = smov %s4865_s12 }
 0xffe   : > { %s4871_s21 = smov %s4867_s14 }
0x1000   :  { %2797 = vsyncpa [#allocation8], 1 }
0x1001   :  { %2799 = vsyncpa [#allocation8 + $0x1], 1 }
0x1002   :  { %2800 = vsyncpa [#allocation11], 1 }
0x1003   :  { %2802 = vsyncpa [#allocation11 + $0x1], 1 }
0x1004   :  { %2803 = vsyncpa [#allocation14], 1 }
0x1005   :  { %2804 = vsyncpa [#allocation17], 1 }
0x1006   :  { %2805 = vsyncpa [#allocation20], 1 }
0x1007   :  { %2806 = vsyncpa [#allocation9], 1 }
0x1008   :  { %2808 = vsyncpa [#allocation9 + $0x1], 1 }

</bundles_post_ra>
